<compile_context>
chip_gen: v6e
topology: v6e:2x2x1
jax: 0.10.0
libtpu: 0.0.40
codegen_flags: <defaults>
</compile_context>

<pallas_src>
import jax
import jax.numpy as jnp
from jax.experimental import pallas as pl
from jax.experimental.pallas import tpu as pltpu

LANE = 128
SUBLANE = 8
NUM_CLASSES = 5


def _round_up(x, m):
    return (x + m - 1) // m * m


def _pad_axis(x, target, axis):
    pad = target - x.shape[axis]
    if pad == 0:
        return x
    widths = [(0, 0)] * x.ndim
    widths[axis] = (0, pad)
    return jnp.pad(x, widths)


def _pad_gate_cols(w, h, h_pad):
    """w[..., 4h] in PyTorch gate order [i|f|g|o] -> [..., 4*h_pad]; each gate
    block is zero-padded to h_pad so gate slices are exact 128-lane tiles."""
    parts = [_pad_axis(w[..., k * h:(k + 1) * h], h_pad, w.ndim - 1)
             for k in range(4)]
    return jnp.concatenate(parts, axis=-1)


def lstm_head_kernel(x_ref, wih_ref, whh_ref, b_ref, wl_ref, bl_ref,
                     o_ref, h_scr, c_scr):
    """One (batch-block, time-block) grid step of the LSTM + classifier head.

    x_ref:   (T_blk*B_blk, E_pad)  bf16   time-major rows of this batch block
    wih_ref: (E_pad, 4*H_pad)      bf16   input->gates weights (resident)
    whh_ref: (H_pad, 4*H_pad)      bf16   hidden->gates weights (resident)
    b_ref:   (1, 4*H_pad)          f32    b_ih + b_hh (per-gate padded)
    wl_ref:  (H_pad, 128)          f32    classifier weight (lane-dense pad)
    bl_ref:  (1, 128)              f32    classifier bias   (lane-dense pad)
    o_ref:   (B_blk, 128)          f32    logits, valid columns [:5]
    h_scr/c_scr: (B_blk, H_pad)    f32    recurrent state carried across time blocks
    """
    t_idx = pl.program_id(1)
    Bb, H = h_scr.shape
    Tt = x_ref.shape[0] // Bb

    @pl.when(t_idx == 0)
    def _init():
        h_scr[...] = jnp.zeros_like(h_scr)
        c_scr[...] = jnp.zeros_like(c_scr)

    # Hoisted input projection: one large bf16 MXU matmul for the whole time
    # block + a single bias broadcast (kept out of the serial loop).
    pre = jnp.dot(x_ref[...], wih_ref[...],
                  preferred_element_type=jnp.float32) + b_ref[...]

    whh = whh_ref[...]          # bf16, resident
    h = h_scr[...]
    c = c_scr[...]

    # Static unroll (Tt is compile-time constant): only h @ W_hh remains on the
    # serial dependence chain; sigmoid/tanh go to the EUP, mul/add to the VPU.
    for t in range(Tt):
        gates = pre[t * Bb:(t + 1) * Bb, :] + jnp.dot(
            h.astype(jnp.bfloat16), whh, preferred_element_type=jnp.float32)
        # PyTorch gate ordering: input, forget, cell(g), output — lane-aligned
        # slices since H is padded to a multiple of 128.
        i = jax.nn.sigmoid(gates[:, 0 * H:1 * H])
        f = jax.nn.sigmoid(gates[:, 1 * H:2 * H])
        g = jnp.tanh(gates[:, 2 * H:3 * H])
        o = jax.nn.sigmoid(gates[:, 3 * H:4 * H])
        c = f * c + i * g
        h = o * jnp.tanh(c)

    h_scr[...] = h
    c_scr[...] = c

    @pl.when(t_idx == pl.num_programs(1) - 1)
    def _finalize():
        # Lane-dense (B_blk, 128) store; wrapper slices the first 5 columns.
        o_ref[...] = (jnp.dot(h, wl_ref[...], preferred_element_type=jnp.float32)
                      + bl_ref[...])


def lstm_glove_forward(x_tokens, lengths, params):
    """Full forward pass. Embedding lookup + pad/cast are wrapper glue; the
    LSTM recurrence and the classifier head run inside the Pallas kernel."""
    del lengths  # unused, as in the PyTorch forward (it never packs)
    emb = params["embedding"]
    w_ih, w_hh = params["w_ih"], params["w_hh"]
    bias, w_lin, b_lin = params["b"], params["w_lin"], params["b_lin"]

    B, T = x_tokens.shape
    E = emb.shape[1]
    H = w_hh.shape[0]

    # ---- hardware-aligned padded sizes --------------------------------------
    E_pad = _round_up(E, LANE)
    H_pad = _round_up(H, LANE)
    B_blk = min(128, _round_up(B, SUBLANE))
    B_pad = _round_up(B, B_blk)
    nb = B_pad // B_blk
    # Time tiling: whole sequence per block for short T; for long sequences a
    # divisor block lets Pallas double-buffer the x DMA behind the recurrence.
    T_blk = T if T <= 64 else next((c for c in range(64, 0, -1) if T % c == 0), T)
    nt = T // T_blk

    # ---- embedding lookup + eval-mode Dropout(0.2) == identity --------------
    # TODO(synk): training-mode dropout (pltpu.prng_*) not implemented.
    x_emb = jnp.take(emb, x_tokens, axis=0).astype(jnp.float32)     # (B, T, E)

    # Time-major, padded, batch-block-major bf16 input. All of this fuses into
    # the single pad/cast copy XLA must do anyway (no extra HBM transpose pass).
    x_tm = jnp.transpose(x_emb, (1, 0, 2))                          # (T, B, E)
    x_tm = _pad_axis(_pad_axis(x_tm, B_pad, 1), E_pad, 2)           # (T, Bp, Ep)
    x_blk = (x_tm.reshape(T, nb, B_blk, E_pad)
                 .transpose(1, 0, 2, 3)
                 .reshape(nb, T * B_blk, E_pad)
                 .astype(jnp.bfloat16))

    # ---- per-gate padded weights; matmul operands bf16, f32 accumulate ------
    wih_p = _pad_gate_cols(_pad_axis(w_ih, E_pad, 0), H, H_pad).astype(jnp.bfloat16)
    whh_p = _pad_gate_cols(_pad_axis(w_hh, H_pad, 0), H, H_pad).astype(jnp.bfloat16)
    b_p = _pad_gate_cols(bias, H, H_pad).astype(jnp.float32)
    wl_p = _pad_axis(_pad_axis(w_lin, H_pad, 0), LANE, 1).astype(jnp.float32)
    bl_p = _pad_axis(b_lin, LANE, 1).astype(jnp.float32)

    four_h = 4 * H_pad
    const = lambda b, t: (0, 0)

    out = pl.pallas_call(
        lstm_head_kernel,
        out_shape=jax.ShapeDtypeStruct((B_pad, LANE), jnp.float32),
        grid=(nb, nt),
        in_specs=[
            pl.BlockSpec((None, T_blk * B_blk, E_pad), lambda b, t: (b, t, 0)),
            pl.BlockSpec((E_pad, four_h), const),    # W_ih (resident)
            pl.BlockSpec((H_pad, four_h), const),    # W_hh (resident)
            pl.BlockSpec((1, four_h), const),        # fused bias
            pl.BlockSpec((H_pad, LANE), const),      # W_lin
            pl.BlockSpec((1, LANE), const),          # b_lin
        ],
        out_specs=pl.BlockSpec((B_blk, LANE), lambda b, t: (b, 0)),
        scratch_shapes=[
            pltpu.VMEM((B_blk, H_pad), jnp.float32),   # h carry
            pltpu.VMEM((B_blk, H_pad), jnp.float32),   # c carry
        ],
        compiler_params=pltpu.CompilerParams(
            dimension_semantics=("parallel", "arbitrary"),
            vmem_limit_bytes=32 * 1024 * 1024,
        ),
    )(x_blk, wih_p, whh_p, b_p, wl_p, bl_p)

    return out[:B, :NUM_CLASSES]


def make_params(key, vocab_size, embedding_dim, hidden_dim):
    ks = jax.random.split(key, 7)
    scale = 1.0 / jnp.sqrt(jnp.float32(hidden_dim))

    glove = jax.random.normal(ks[0], (vocab_size, embedding_dim), jnp.float32)
    glove = glove.at[0].set(0.0)  # padding_idx=0 row

    w_ih = jax.random.uniform(ks[1], (embedding_dim, 4 * hidden_dim),
                              jnp.float32, -scale, scale)
    w_hh = jax.random.uniform(ks[2], (hidden_dim, 4 * hidden_dim),
                              jnp.float32, -scale, scale)
    b_ih = jax.random.uniform(ks[3], (4 * hidden_dim,), jnp.float32, -scale, scale)
    b_hh = jax.random.uniform(ks[4], (4 * hidden_dim,), jnp.float32, -scale, scale)
    w_lin = jax.random.uniform(ks[5], (hidden_dim, 5), jnp.float32, -scale, scale)
    b_lin = jax.random.uniform(ks[6], (5,), jnp.float32, -scale, scale)

    return {
        "embedding": glove,
        "w_ih": w_ih,
        "w_hh": w_hh,
        "b": (b_ih + b_hh).reshape(1, -1),
        "w_lin": w_lin,
        "b_lin": b_lin.reshape(1, -1),
    }


def reference_forward(x_tokens, params):
    """Pure-JAX reference of the same math (bf16 matmul operands, f32
    accumulation/elementwise) for a tight correctness check."""
    emb = jnp.take(params["embedding"], x_tokens, axis=0).astype(jnp.float32)
    B, T, E = emb.shape
    H = params["w_hh"].shape[0]
    wih = params["w_ih"].astype(jnp.bfloat16)
    whh = params["w_hh"].astype(jnp.bfloat16)
    b = params["b"]
    h = jnp.zeros((B, H), jnp.float32)
    c = jnp.zeros((B, H), jnp.float32)
    for t in range(T):
        x_t = emb[:, t, :].astype(jnp.bfloat16)
        gates = (jnp.dot(x_t, wih, preferred_element_type=jnp.float32) + b
                 + jnp.dot(h.astype(jnp.bfloat16), whh,
                           preferred_element_type=jnp.float32))
        i = jax.nn.sigmoid(gates[:, 0 * H:1 * H])
        f = jax.nn.sigmoid(gates[:, 1 * H:2 * H])
        g = jnp.tanh(gates[:, 2 * H:3 * H])
        o = jax.nn.sigmoid(gates[:, 3 * H:4 * H])
        c = f * c + i * g
        h = o * jnp.tanh(c)
    return (jnp.dot(h, params["w_lin"], preferred_element_type=jnp.float32)
            + params["b_lin"])


if __name__ == "__main__":
    key = jax.random.PRNGKey(0)
    k_par, k_tok, _ = jax.random.split(key, 3)

    # Small shapes consistent with the module: words = ['', 'UNK'] -> vocab=2.
    vocab_size = 2
    embedding_dim = 32
    hidden_dim = 32
    batch = 2
    seq_len = 8

    params = make_params(k_par, vocab_size, embedding_dim, hidden_dim)
    x_tokens = jax.random.randint(k_tok, (batch, seq_len), 0, vocab_size,
                                  dtype=jnp.int32)
    lengths = jnp.full((batch,), seq_len, dtype=jnp.int32)

    logits = lstm_glove_forward(x_tokens, lengths, params)
    logits = jax.block_until_ready(logits)

    ref = reference_forward(x_tokens, params)
    assert logits.shape == (batch, NUM_CLASSES)
    assert jnp.allclose(logits, ref, atol=2e-3, rtol=2e-3)

    print("KERNEL_OK")
</pallas_src>

<mosaic_0001>
module attributes {stable_mosaic.version = 11 : i64} {
  func.func @lstm_head_kernel(%arg0: i32, %arg1: i32, %arg2: memref<1x64x128xbf16, #tpu.memory_space<vmem>>, %arg3: memref<128x512xbf16, #tpu.memory_space<vmem>>, %arg4: memref<128x512xbf16, #tpu.memory_space<vmem>>, %arg5: memref<1x512xf32, #tpu.memory_space<vmem>>, %arg6: memref<128x128xf32, #tpu.memory_space<vmem>>, %arg7: memref<1x128xf32, #tpu.memory_space<vmem>>, %arg8: memref<8x128xf32, #tpu.memory_space<vmem>>, %arg9: memref<8x128xf32, #tpu.memory_space<vmem>>, %arg10: memref<8x128xf32, #tpu.memory_space<vmem>>) attributes {dimension_semantics = [#tpu.dimension_semantics<parallel>, #tpu.dimension_semantics<arbitrary>], iteration_bounds = array<i64: 1, 1>, scalar_prefetch = 0 : i64, scratch_operands = 2 : i64, tpu.core_type = #tpu.core_type<tc>, window_params = [{transform_indices = @transform_0, window_bounds = array<i64: 1, 64, 128>}, {pipeline_mode = #tpu.pipeline_mode<synchronous>, transform_indices = @transform_1, window_bounds = array<i64: 128, 512>}, {pipeline_mode = #tpu.pipeline_mode<synchronous>, transform_indices = @transform_2, window_bounds = array<i64: 128, 512>}, {pipeline_mode = #tpu.pipeline_mode<synchronous>, transform_indices = @transform_3, window_bounds = array<i64: 1, 512>}, {pipeline_mode = #tpu.pipeline_mode<synchronous>, transform_indices = @transform_4, window_bounds = array<i64: 128, 128>}, {pipeline_mode = #tpu.pipeline_mode<synchronous>, transform_indices = @transform_5, window_bounds = array<i64: 1, 128>}, {transform_indices = @transform_6, window_bounds = array<i64: 8, 128>}]} {
    %c0_i32 = arith.constant 0 : i32
    %0 = arith.cmpi eq, %arg1, %c0_i32 : i32
    %1 = arith.extui %0 : i1 to i32
    %c0_i32_0 = arith.constant 0 : i32
    %2 = arith.cmpi ne, %1, %c0_i32_0 : i32
    scf.if %2 {
      %cst_51 = arith.constant 0.000000e+00 : f32
      %250 = vector.broadcast %cst_51 : f32 to vector<8x128xf32>
      %c0_52 = arith.constant 0 : index
      %c0_53 = arith.constant 0 : index
      %251 = vector.load %arg9[%c0_52, %c0_53] : memref<8x128xf32, #tpu.memory_space<vmem>>, vector<8x128xf32>
      tpu.vector_store %arg9[%c0_52, %c0_53], %250 {strides = array<i32>} : memref<8x128xf32, #tpu.memory_space<vmem>>, vector<8x128xf32>,
      %cst_54 = arith.constant 0.000000e+00 : f32
      %252 = vector.broadcast %cst_54 : f32 to vector<8x128xf32>
      %c0_55 = arith.constant 0 : index
      %c0_56 = arith.constant 0 : index
      %253 = vector.load %arg10[%c0_55, %c0_56] : memref<8x128xf32, #tpu.memory_space<vmem>>, vector<8x128xf32>
      tpu.vector_store %arg10[%c0_55, %c0_56], %252 {strides = array<i32>} : memref<8x128xf32, #tpu.memory_space<vmem>>, vector<8x128xf32>,
    } else {
    }
    %c0 = arith.constant 0 : index
    %c0_1 = arith.constant 0 : index
    %c0_2 = arith.constant 0 : index
    %3 = vector.load %arg2[%c0, %c0_1, %c0_2] : memref<1x64x128xbf16, #tpu.memory_space<vmem>>, vector<1x64x128xbf16>
    %4 = vector.shape_cast %3 : vector<1x64x128xbf16> to vector<64x128xbf16>
    %c0_3 = arith.constant 0 : index
    %c0_4 = arith.constant 0 : index
    %5 = vector.load %arg3[%c0_3, %c0_4] : memref<128x512xbf16, #tpu.memory_space<vmem>>, vector<128x512xbf16>
    %cst = arith.constant dense<0.000000e+00> : vector<64x512xf32>
    %6 = tpu.matmul %4, %5, %cst {dimension_numbers = #tpu.dot_dimension_numbers<[1], [0], [0], [1], [0, 0, 1, 1], [], []>} : vector<64x128xbf16>, vector<128x512xbf16>, vector<64x512xf32> -> vector<64x512xf32>
    %c0_5 = arith.constant 0 : index
    %c0_6 = arith.constant 0 : index
    %7 = vector.load %arg5[%c0_5, %c0_6] : memref<1x512xf32, #tpu.memory_space<vmem>>, vector<1x512xf32>
    %8 = vector.broadcast %7 : vector<1x512xf32> to vector<64x512xf32>
    %9 = arith.addf %6, %8 : vector<64x512xf32>
    %c0_7 = arith.constant 0 : index
    %c0_8 = arith.constant 0 : index
    %10 = vector.load %arg4[%c0_7, %c0_8] : memref<128x512xbf16, #tpu.memory_space<vmem>>, vector<128x512xbf16>
    %c0_9 = arith.constant 0 : index
    %c0_10 = arith.constant 0 : index
    %11 = vector.load %arg9[%c0_9, %c0_10] : memref<8x128xf32, #tpu.memory_space<vmem>>, vector<8x128xf32>
    %c0_11 = arith.constant 0 : index
    %c0_12 = arith.constant 0 : index
    %12 = vector.load %arg10[%c0_11, %c0_12] : memref<8x128xf32, #tpu.memory_space<vmem>>, vector<8x128xf32>
    %13 = vector.extract_strided_slice %9 {offsets = [0, 0], sizes = [8, 512], strides = [1, 1]} : vector<64x512xf32> to vector<8x512xf32>
    %14 = arith.truncf %11 : vector<8x128xf32> to vector<8x128xbf16>
    %cst_13 = arith.constant dense<0.000000e+00> : vector<8x512xf32>
    %15 = tpu.matmul %14, %10, %cst_13 {dimension_numbers = #tpu.dot_dimension_numbers<[1], [0], [0], [1], [0, 0, 1, 1], [], []>} : vector<8x128xbf16>, vector<128x512xbf16>, vector<8x512xf32> -> vector<8x512xf32>
    %16 = arith.addf %13, %15 : vector<8x512xf32>
    %17 = vector.extract_strided_slice %16 {offsets = [0, 0], sizes = [8, 128], strides = [1, 1]} : vector<8x512xf32> to vector<8x128xf32>
    %18 = arith.negf %17 : vector<8x128xf32>
    %19 = math.exp %18 : vector<8x128xf32>
    %cst_14 = arith.constant 1.000000e+00 : f32
    %20 = vector.broadcast %cst_14 : f32 to vector<8x128xf32>
    %21 = arith.addf %20, %19 : vector<8x128xf32>
    %22 = arith.divf %20, %21 : vector<8x128xf32>
    %23 = vector.extract_strided_slice %16 {offsets = [0, 128], sizes = [8, 128], strides = [1, 1]} : vector<8x512xf32> to vector<8x128xf32>
    %24 = arith.negf %23 : vector<8x128xf32>
    %25 = math.exp %24 : vector<8x128xf32>
    %cst_15 = arith.constant 1.000000e+00 : f32
    %26 = vector.broadcast %cst_15 : f32 to vector<8x128xf32>
    %27 = arith.addf %26, %25 : vector<8x128xf32>
    %28 = arith.divf %26, %27 : vector<8x128xf32>
    %29 = vector.extract_strided_slice %16 {offsets = [0, 256], sizes = [8, 128], strides = [1, 1]} : vector<8x512xf32> to vector<8x128xf32>
    %30 = math.tanh %29 : vector<8x128xf32>
    %31 = vector.extract_strided_slice %16 {offsets = [0, 384], sizes = [8, 128], strides = [1, 1]} : vector<8x512xf32> to vector<8x128xf32>
    %32 = arith.negf %31 : vector<8x128xf32>
    %33 = math.exp %32 : vector<8x128xf32>
    %cst_16 = arith.constant 1.000000e+00 : f32
    %34 = vector.broadcast %cst_16 : f32 to vector<8x128xf32>
    %35 = arith.addf %34, %33 : vector<8x128xf32>
    %36 = arith.divf %34, %35 : vector<8x128xf32>
    %37 = arith.mulf %28, %12 : vector<8x128xf32>
    %38 = arith.mulf %22, %30 : vector<8x128xf32>
    %39 = arith.addf %37, %38 : vector<8x128xf32>
    %40 = math.tanh %39 : vector<8x128xf32>
    %41 = arith.mulf %36, %40 : vector<8x128xf32>
    %42 = vector.extract_strided_slice %9 {offsets = [8, 0], sizes = [8, 512], strides = [1, 1]} : vector<64x512xf32> to vector<8x512xf32>
    %43 = arith.truncf %41 : vector<8x128xf32> to vector<8x128xbf16>
    %cst_17 = arith.constant dense<0.000000e+00> : vector<8x512xf32>
    %44 = tpu.matmul %43, %10, %cst_17 {dimension_numbers = #tpu.dot_dimension_numbers<[1], [0], [0], [1], [0, 0, 1, 1], [], []>} : vector<8x128xbf16>, vector<128x512xbf16>, vector<8x512xf32> -> vector<8x512xf32>
    %45 = arith.addf %42, %44 : vector<8x512xf32>
    %46 = vector.extract_strided_slice %45 {offsets = [0, 0], sizes = [8, 128], strides = [1, 1]} : vector<8x512xf32> to vector<8x128xf32>
    %47 = arith.negf %46 : vector<8x128xf32>
    %48 = math.exp %47 : vector<8x128xf32>
    %cst_18 = arith.constant 1.000000e+00 : f32
    %49 = vector.broadcast %cst_18 : f32 to vector<8x128xf32>
    %50 = arith.addf %49, %48 : vector<8x128xf32>
    %51 = arith.divf %49, %50 : vector<8x128xf32>
    %52 = vector.extract_strided_slice %45 {offsets = [0, 128], sizes = [8, 128], strides = [1, 1]} : vector<8x512xf32> to vector<8x128xf32>
    %53 = arith.negf %52 : vector<8x128xf32>
    %54 = math.exp %53 : vector<8x128xf32>
    %cst_19 = arith.constant 1.000000e+00 : f32
    %55 = vector.broadcast %cst_19 : f32 to vector<8x128xf32>
    %56 = arith.addf %55, %54 : vector<8x128xf32>
    %57 = arith.divf %55, %56 : vector<8x128xf32>
    %58 = vector.extract_strided_slice %45 {offsets = [0, 256], sizes = [8, 128], strides = [1, 1]} : vector<8x512xf32> to vector<8x128xf32>
    %59 = math.tanh %58 : vector<8x128xf32>
    %60 = vector.extract_strided_slice %45 {offsets = [0, 384], sizes = [8, 128], strides = [1, 1]} : vector<8x512xf32> to vector<8x128xf32>
    %61 = arith.negf %60 : vector<8x128xf32>
    %62 = math.exp %61 : vector<8x128xf32>
    %cst_20 = arith.constant 1.000000e+00 : f32
    %63 = vector.broadcast %cst_20 : f32 to vector<8x128xf32>
    %64 = arith.addf %63, %62 : vector<8x128xf32>
    %65 = arith.divf %63, %64 : vector<8x128xf32>
    %66 = arith.mulf %57, %39 : vector<8x128xf32>
    %67 = arith.mulf %51, %59 : vector<8x128xf32>
    %68 = arith.addf %66, %67 : vector<8x128xf32>
    %69 = math.tanh %68 : vector<8x128xf32>
    %70 = arith.mulf %65, %69 : vector<8x128xf32>
    %71 = vector.extract_strided_slice %9 {offsets = [16, 0], sizes = [8, 512], strides = [1, 1]} : vector<64x512xf32> to vector<8x512xf32>
    %72 = arith.truncf %70 : vector<8x128xf32> to vector<8x128xbf16>
    %cst_21 = arith.constant dense<0.000000e+00> : vector<8x512xf32>
    %73 = tpu.matmul %72, %10, %cst_21 {dimension_numbers = #tpu.dot_dimension_numbers<[1], [0], [0], [1], [0, 0, 1, 1], [], []>} : vector<8x128xbf16>, vector<128x512xbf16>, vector<8x512xf32> -> vector<8x512xf32>
    %74 = arith.addf %71, %73 : vector<8x512xf32>
    %75 = vector.extract_strided_slice %74 {offsets = [0, 0], sizes = [8, 128], strides = [1, 1]} : vector<8x512xf32> to vector<8x128xf32>
    %76 = arith.negf %75 : vector<8x128xf32>
    %77 = math.exp %76 : vector<8x128xf32>
    %cst_22 = arith.constant 1.000000e+00 : f32
    %78 = vector.broadcast %cst_22 : f32 to vector<8x128xf32>
    %79 = arith.addf %78, %77 : vector<8x128xf32>
    %80 = arith.divf %78, %79 : vector<8x128xf32>
    %81 = vector.extract_strided_slice %74 {offsets = [0, 128], sizes = [8, 128], strides = [1, 1]} : vector<8x512xf32> to vector<8x128xf32>
    %82 = arith.negf %81 : vector<8x128xf32>
    %83 = math.exp %82 : vector<8x128xf32>
    %cst_23 = arith.constant 1.000000e+00 : f32
    %84 = vector.broadcast %cst_23 : f32 to vector<8x128xf32>
    %85 = arith.addf %84, %83 : vector<8x128xf32>
    %86 = arith.divf %84, %85 : vector<8x128xf32>
    %87 = vector.extract_strided_slice %74 {offsets = [0, 256], sizes = [8, 128], strides = [1, 1]} : vector<8x512xf32> to vector<8x128xf32>
    %88 = math.tanh %87 : vector<8x128xf32>
    %89 = vector.extract_strided_slice %74 {offsets = [0, 384], sizes = [8, 128], strides = [1, 1]} : vector<8x512xf32> to vector<8x128xf32>
    %90 = arith.negf %89 : vector<8x128xf32>
    %91 = math.exp %90 : vector<8x128xf32>
    %cst_24 = arith.constant 1.000000e+00 : f32
    %92 = vector.broadcast %cst_24 : f32 to vector<8x128xf32>
    %93 = arith.addf %92, %91 : vector<8x128xf32>
    %94 = arith.divf %92, %93 : vector<8x128xf32>
    %95 = arith.mulf %86, %68 : vector<8x128xf32>
    %96 = arith.mulf %80, %88 : vector<8x128xf32>
    %97 = arith.addf %95, %96 : vector<8x128xf32>
    %98 = math.tanh %97 : vector<8x128xf32>
    %99 = arith.mulf %94, %98 : vector<8x128xf32>
    %100 = vector.extract_strided_slice %9 {offsets = [24, 0], sizes = [8, 512], strides = [1, 1]} : vector<64x512xf32> to vector<8x512xf32>
    %101 = arith.truncf %99 : vector<8x128xf32> to vector<8x128xbf16>
    %cst_25 = arith.constant dense<0.000000e+00> : vector<8x512xf32>
    %102 = tpu.matmul %101, %10, %cst_25 {dimension_numbers = #tpu.dot_dimension_numbers<[1], [0], [0], [1], [0, 0, 1, 1], [], []>} : vector<8x128xbf16>, vector<128x512xbf16>, vector<8x512xf32> -> vector<8x512xf32>
    %103 = arith.addf %100, %102 : vector<8x512xf32>
    %104 = vector.extract_strided_slice %103 {offsets = [0, 0], sizes = [8, 128], strides = [1, 1]} : vector<8x512xf32> to vector<8x128xf32>
    %105 = arith.negf %104 : vector<8x128xf32>
    %106 = math.exp %105 : vector<8x128xf32>
    %cst_26 = arith.constant 1.000000e+00 : f32
    %107 = vector.broadcast %cst_26 : f32 to vector<8x128xf32>
    %108 = arith.addf %107, %106 : vector<8x128xf32>
    %109 = arith.divf %107, %108 : vector<8x128xf32>
    %110 = vector.extract_strided_slice %103 {offsets = [0, 128], sizes = [8, 128], strides = [1, 1]} : vector<8x512xf32> to vector<8x128xf32>
    %111 = arith.negf %110 : vector<8x128xf32>
    %112 = math.exp %111 : vector<8x128xf32>
    %cst_27 = arith.constant 1.000000e+00 : f32
    %113 = vector.broadcast %cst_27 : f32 to vector<8x128xf32>
    %114 = arith.addf %113, %112 : vector<8x128xf32>
    %115 = arith.divf %113, %114 : vector<8x128xf32>
    %116 = vector.extract_strided_slice %103 {offsets = [0, 256], sizes = [8, 128], strides = [1, 1]} : vector<8x512xf32> to vector<8x128xf32>
    %117 = math.tanh %116 : vector<8x128xf32>
    %118 = vector.extract_strided_slice %103 {offsets = [0, 384], sizes = [8, 128], strides = [1, 1]} : vector<8x512xf32> to vector<8x128xf32>
    %119 = arith.negf %118 : vector<8x128xf32>
    %120 = math.exp %119 : vector<8x128xf32>
    %cst_28 = arith.constant 1.000000e+00 : f32
    %121 = vector.broadcast %cst_28 : f32 to vector<8x128xf32>
    %122 = arith.addf %121, %120 : vector<8x128xf32>
    %123 = arith.divf %121, %122 : vector<8x128xf32>
    %124 = arith.mulf %115, %97 : vector<8x128xf32>
    %125 = arith.mulf %109, %117 : vector<8x128xf32>
    %126 = arith.addf %124, %125 : vector<8x128xf32>
    %127 = math.tanh %126 : vector<8x128xf32>
    %128 = arith.mulf %123, %127 : vector<8x128xf32>
    %129 = vector.extract_strided_slice %9 {offsets = [32, 0], sizes = [8, 512], strides = [1, 1]} : vector<64x512xf32> to vector<8x512xf32>
    %130 = arith.truncf %128 : vector<8x128xf32> to vector<8x128xbf16>
    %cst_29 = arith.constant dense<0.000000e+00> : vector<8x512xf32>
    %131 = tpu.matmul %130, %10, %cst_29 {dimension_numbers = #tpu.dot_dimension_numbers<[1], [0], [0], [1], [0, 0, 1, 1], [], []>} : vector<8x128xbf16>, vector<128x512xbf16>, vector<8x512xf32> -> vector<8x512xf32>
    %132 = arith.addf %129, %131 : vector<8x512xf32>
    %133 = vector.extract_strided_slice %132 {offsets = [0, 0], sizes = [8, 128], strides = [1, 1]} : vector<8x512xf32> to vector<8x128xf32>
    %134 = arith.negf %133 : vector<8x128xf32>
    %135 = math.exp %134 : vector<8x128xf32>
    %cst_30 = arith.constant 1.000000e+00 : f32
    %136 = vector.broadcast %cst_30 : f32 to vector<8x128xf32>
    %137 = arith.addf %136, %135 : vector<8x128xf32>
    %138 = arith.divf %136, %137 : vector<8x128xf32>
    %139 = vector.extract_strided_slice %132 {offsets = [0, 128], sizes = [8, 128], strides = [1, 1]} : vector<8x512xf32> to vector<8x128xf32>
    %140 = arith.negf %139 : vector<8x128xf32>
    %141 = math.exp %140 : vector<8x128xf32>
    %cst_31 = arith.constant 1.000000e+00 : f32
    %142 = vector.broadcast %cst_31 : f32 to vector<8x128xf32>
    %143 = arith.addf %142, %141 : vector<8x128xf32>
    %144 = arith.divf %142, %143 : vector<8x128xf32>
    %145 = vector.extract_strided_slice %132 {offsets = [0, 256], sizes = [8, 128], strides = [1, 1]} : vector<8x512xf32> to vector<8x128xf32>
    %146 = math.tanh %145 : vector<8x128xf32>
    %147 = vector.extract_strided_slice %132 {offsets = [0, 384], sizes = [8, 128], strides = [1, 1]} : vector<8x512xf32> to vector<8x128xf32>
    %148 = arith.negf %147 : vector<8x128xf32>
    %149 = math.exp %148 : vector<8x128xf32>
    %cst_32 = arith.constant 1.000000e+00 : f32
    %150 = vector.broadcast %cst_32 : f32 to vector<8x128xf32>
    %151 = arith.addf %150, %149 : vector<8x128xf32>
    %152 = arith.divf %150, %151 : vector<8x128xf32>
    %153 = arith.mulf %144, %126 : vector<8x128xf32>
    %154 = arith.mulf %138, %146 : vector<8x128xf32>
    %155 = arith.addf %153, %154 : vector<8x128xf32>
    %156 = math.tanh %155 : vector<8x128xf32>
    %157 = arith.mulf %152, %156 : vector<8x128xf32>
    %158 = vector.extract_strided_slice %9 {offsets = [40, 0], sizes = [8, 512], strides = [1, 1]} : vector<64x512xf32> to vector<8x512xf32>
    %159 = arith.truncf %157 : vector<8x128xf32> to vector<8x128xbf16>
    %cst_33 = arith.constant dense<0.000000e+00> : vector<8x512xf32>
    %160 = tpu.matmul %159, %10, %cst_33 {dimension_numbers = #tpu.dot_dimension_numbers<[1], [0], [0], [1], [0, 0, 1, 1], [], []>} : vector<8x128xbf16>, vector<128x512xbf16>, vector<8x512xf32> -> vector<8x512xf32>
    %161 = arith.addf %158, %160 : vector<8x512xf32>
    %162 = vector.extract_strided_slice %161 {offsets = [0, 0], sizes = [8, 128], strides = [1, 1]} : vector<8x512xf32> to vector<8x128xf32>
    %163 = arith.negf %162 : vector<8x128xf32>
    %164 = math.exp %163 : vector<8x128xf32>
    %cst_34 = arith.constant 1.000000e+00 : f32
    %165 = vector.broadcast %cst_34 : f32 to vector<8x128xf32>
    %166 = arith.addf %165, %164 : vector<8x128xf32>
    %167 = arith.divf %165, %166 : vector<8x128xf32>
    %168 = vector.extract_strided_slice %161 {offsets = [0, 128], sizes = [8, 128], strides = [1, 1]} : vector<8x512xf32> to vector<8x128xf32>
    %169 = arith.negf %168 : vector<8x128xf32>
    %170 = math.exp %169 : vector<8x128xf32>
    %cst_35 = arith.constant 1.000000e+00 : f32
    %171 = vector.broadcast %cst_35 : f32 to vector<8x128xf32>
    %172 = arith.addf %171, %170 : vector<8x128xf32>
    %173 = arith.divf %171, %172 : vector<8x128xf32>
    %174 = vector.extract_strided_slice %161 {offsets = [0, 256], sizes = [8, 128], strides = [1, 1]} : vector<8x512xf32> to vector<8x128xf32>
    %175 = math.tanh %174 : vector<8x128xf32>
    %176 = vector.extract_strided_slice %161 {offsets = [0, 384], sizes = [8, 128], strides = [1, 1]} : vector<8x512xf32> to vector<8x128xf32>
    %177 = arith.negf %176 : vector<8x128xf32>
    %178 = math.exp %177 : vector<8x128xf32>
    %cst_36 = arith.constant 1.000000e+00 : f32
    %179 = vector.broadcast %cst_36 : f32 to vector<8x128xf32>
    %180 = arith.addf %179, %178 : vector<8x128xf32>
    %181 = arith.divf %179, %180 : vector<8x128xf32>
    %182 = arith.mulf %173, %155 : vector<8x128xf32>
    %183 = arith.mulf %167, %175 : vector<8x128xf32>
    %184 = arith.addf %182, %183 : vector<8x128xf32>
    %185 = math.tanh %184 : vector<8x128xf32>
    %186 = arith.mulf %181, %185 : vector<8x128xf32>
    %187 = vector.extract_strided_slice %9 {offsets = [48, 0], sizes = [8, 512], strides = [1, 1]} : vector<64x512xf32> to vector<8x512xf32>
    %188 = arith.truncf %186 : vector<8x128xf32> to vector<8x128xbf16>
    %cst_37 = arith.constant dense<0.000000e+00> : vector<8x512xf32>
    %189 = tpu.matmul %188, %10, %cst_37 {dimension_numbers = #tpu.dot_dimension_numbers<[1], [0], [0], [1], [0, 0, 1, 1], [], []>} : vector<8x128xbf16>, vector<128x512xbf16>, vector<8x512xf32> -> vector<8x512xf32>
    %190 = arith.addf %187, %189 : vector<8x512xf32>
    %191 = vector.extract_strided_slice %190 {offsets = [0, 0], sizes = [8, 128], strides = [1, 1]} : vector<8x512xf32> to vector<8x128xf32>
    %192 = arith.negf %191 : vector<8x128xf32>
    %193 = math.exp %192 : vector<8x128xf32>
    %cst_38 = arith.constant 1.000000e+00 : f32
    %194 = vector.broadcast %cst_38 : f32 to vector<8x128xf32>
    %195 = arith.addf %194, %193 : vector<8x128xf32>
    %196 = arith.divf %194, %195 : vector<8x128xf32>
    %197 = vector.extract_strided_slice %190 {offsets = [0, 128], sizes = [8, 128], strides = [1, 1]} : vector<8x512xf32> to vector<8x128xf32>
    %198 = arith.negf %197 : vector<8x128xf32>
    %199 = math.exp %198 : vector<8x128xf32>
    %cst_39 = arith.constant 1.000000e+00 : f32
    %200 = vector.broadcast %cst_39 : f32 to vector<8x128xf32>
    %201 = arith.addf %200, %199 : vector<8x128xf32>
    %202 = arith.divf %200, %201 : vector<8x128xf32>
    %203 = vector.extract_strided_slice %190 {offsets = [0, 256], sizes = [8, 128], strides = [1, 1]} : vector<8x512xf32> to vector<8x128xf32>
    %204 = math.tanh %203 : vector<8x128xf32>
    %205 = vector.extract_strided_slice %190 {offsets = [0, 384], sizes = [8, 128], strides = [1, 1]} : vector<8x512xf32> to vector<8x128xf32>
    %206 = arith.negf %205 : vector<8x128xf32>
    %207 = math.exp %206 : vector<8x128xf32>
    %cst_40 = arith.constant 1.000000e+00 : f32
    %208 = vector.broadcast %cst_40 : f32 to vector<8x128xf32>
    %209 = arith.addf %208, %207 : vector<8x128xf32>
    %210 = arith.divf %208, %209 : vector<8x128xf32>
    %211 = arith.mulf %202, %184 : vector<8x128xf32>
    %212 = arith.mulf %196, %204 : vector<8x128xf32>
    %213 = arith.addf %211, %212 : vector<8x128xf32>
    %214 = math.tanh %213 : vector<8x128xf32>
    %215 = arith.mulf %210, %214 : vector<8x128xf32>
    %216 = vector.extract_strided_slice %9 {offsets = [56, 0], sizes = [8, 512], strides = [1, 1]} : vector<64x512xf32> to vector<8x512xf32>
    %217 = arith.truncf %215 : vector<8x128xf32> to vector<8x128xbf16>
    %cst_41 = arith.constant dense<0.000000e+00> : vector<8x512xf32>
    %218 = tpu.matmul %217, %10, %cst_41 {dimension_numbers = #tpu.dot_dimension_numbers<[1], [0], [0], [1], [0, 0, 1, 1], [], []>} : vector<8x128xbf16>, vector<128x512xbf16>, vector<8x512xf32> -> vector<8x512xf32>
    %219 = arith.addf %216, %218 : vector<8x512xf32>
    %220 = vector.extract_strided_slice %219 {offsets = [0, 0], sizes = [8, 128], strides = [1, 1]} : vector<8x512xf32> to vector<8x128xf32>
    %221 = arith.negf %220 : vector<8x128xf32>
    %222 = math.exp %221 : vector<8x128xf32>
    %cst_42 = arith.constant 1.000000e+00 : f32
    %223 = vector.broadcast %cst_42 : f32 to vector<8x128xf32>
    %224 = arith.addf %223, %222 : vector<8x128xf32>
    %225 = arith.divf %223, %224 : vector<8x128xf32>
    %226 = vector.extract_strided_slice %219 {offsets = [0, 128], sizes = [8, 128], strides = [1, 1]} : vector<8x512xf32> to vector<8x128xf32>
    %227 = arith.negf %226 : vector<8x128xf32>
    %228 = math.exp %227 : vector<8x128xf32>
    %cst_43 = arith.constant 1.000000e+00 : f32
    %229 = vector.broadcast %cst_43 : f32 to vector<8x128xf32>
    %230 = arith.addf %229, %228 : vector<8x128xf32>
    %231 = arith.divf %229, %230 : vector<8x128xf32>
    %232 = vector.extract_strided_slice %219 {offsets = [0, 256], sizes = [8, 128], strides = [1, 1]} : vector<8x512xf32> to vector<8x128xf32>
    %233 = math.tanh %232 : vector<8x128xf32>
    %234 = vector.extract_strided_slice %219 {offsets = [0, 384], sizes = [8, 128], strides = [1, 1]} : vector<8x512xf32> to vector<8x128xf32>
    %235 = arith.negf %234 : vector<8x128xf32>
    %236 = math.exp %235 : vector<8x128xf32>
    %cst_44 = arith.constant 1.000000e+00 : f32
    %237 = vector.broadcast %cst_44 : f32 to vector<8x128xf32>
    %238 = arith.addf %237, %236 : vector<8x128xf32>
    %239 = arith.divf %237, %238 : vector<8x128xf32>
    %240 = arith.mulf %231, %213 : vector<8x128xf32>
    %241 = arith.mulf %225, %233 : vector<8x128xf32>
    %242 = arith.addf %240, %241 : vector<8x128xf32>
    %243 = math.tanh %242 : vector<8x128xf32>
    %244 = arith.mulf %239, %243 : vector<8x128xf32>
    %c0_45 = arith.constant 0 : index
    %c0_46 = arith.constant 0 : index
    %245 = vector.load %arg9[%c0_45, %c0_46] : memref<8x128xf32, #tpu.memory_space<vmem>>, vector<8x128xf32>
    tpu.vector_store %arg9[%c0_45, %c0_46], %244 {strides = array<i32>} : memref<8x128xf32, #tpu.memory_space<vmem>>, vector<8x128xf32>,
    %c0_47 = arith.constant 0 : index
    %c0_48 = arith.constant 0 : index
    %246 = vector.load %arg10[%c0_47, %c0_48] : memref<8x128xf32, #tpu.memory_space<vmem>>, vector<8x128xf32>
    tpu.vector_store %arg10[%c0_47, %c0_48], %242 {strides = array<i32>} : memref<8x128xf32, #tpu.memory_space<vmem>>, vector<8x128xf32>,
    %c0_i32_49 = arith.constant 0 : i32
    %247 = arith.cmpi eq, %arg1, %c0_i32_49 : i32
    %248 = arith.extui %247 : i1 to i32
    %c0_i32_50 = arith.constant 0 : i32
    %249 = arith.cmpi ne, %248, %c0_i32_50 : i32
    scf.if %249 {
      %c0_51 = arith.constant 0 : index
      %c0_52 = arith.constant 0 : index
      %250 = vector.load %arg6[%c0_51, %c0_52] : memref<128x128xf32, #tpu.memory_space<vmem>>, vector<128x128xf32>
      %cst_53 = arith.constant dense<0.000000e+00> : vector<8x128xf32>
      %251 = tpu.matmul %244, %250, %cst_53 {dimension_numbers = #tpu.dot_dimension_numbers<[1], [0], [0], [1], [0, 0, 1, 1], [], []>} : vector<8x128xf32>, vector<128x128xf32>, vector<8x128xf32> -> vector<8x128xf32>
      %c0_54 = arith.constant 0 : index
      %c0_55 = arith.constant 0 : index
      %252 = vector.load %arg7[%c0_54, %c0_55] : memref<1x128xf32, #tpu.memory_space<vmem>>, vector<1x128xf32>
      %253 = vector.broadcast %252 : vector<1x128xf32> to vector<8x128xf32>
      %254 = arith.addf %251, %253 : vector<8x128xf32>
      %c0_56 = arith.constant 0 : index
      %c0_57 = arith.constant 0 : index
      %255 = vector.load %arg8[%c0_56, %c0_57] : memref<8x128xf32, #tpu.memory_space<vmem>>, vector<8x128xf32>
      tpu.vector_store %arg8[%c0_56, %c0_57], %254 {strides = array<i32>} : memref<8x128xf32, #tpu.memory_space<vmem>>, vector<8x128xf32>,
    } else {
    }
    return
  }
  func.func @transform_0(%arg0: i32, %arg1: i32) -> (i32, i32, i32) {
    %c0_i32 = arith.constant 0 : i32
    %c0_i32_0 = arith.constant 0 : i32
    return %arg0, %arg1, %c0_i32 : i32, i32, i32
  }
  func.func @transform_1(%arg0: i32, %arg1: i32) -> (i32, i32) {
    %c0_i32 = arith.constant 0 : i32
    %c0_i32_0 = arith.constant 0 : i32
    %c0_i32_1 = arith.constant 0 : i32
    return %c0_i32, %c0_i32_0 : i32, i32
  }
  func.func @transform_2(%arg0: i32, %arg1: i32) -> (i32, i32) {
    %c0_i32 = arith.constant 0 : i32
    %c0_i32_0 = arith.constant 0 : i32
    %c0_i32_1 = arith.constant 0 : i32
    return %c0_i32, %c0_i32_0 : i32, i32
  }
  func.func @transform_3(%arg0: i32, %arg1: i32) -> (i32, i32) {
    %c0_i32 = arith.constant 0 : i32
    %c0_i32_0 = arith.constant 0 : i32
    %c0_i32_1 = arith.constant 0 : i32
    return %c0_i32, %c0_i32_0 : i32, i32
  }
  func.func @transform_4(%arg0: i32, %arg1: i32) -> (i32, i32) {
    %c0_i32 = arith.constant 0 : i32
    %c0_i32_0 = arith.constant 0 : i32
    %c0_i32_1 = arith.constant 0 : i32
    return %c0_i32, %c0_i32_0 : i32, i32
  }
  func.func @transform_5(%arg0: i32, %arg1: i32) -> (i32, i32) {
    %c0_i32 = arith.constant 0 : i32
    %c0_i32_0 = arith.constant 0 : i32
    %c0_i32_1 = arith.constant 0 : i32
    return %c0_i32, %c0_i32_0 : i32, i32
  }
  func.func @transform_6(%arg0: i32, %arg1: i32) -> (i32, i32) {
    %c0_i32 = arith.constant 0 : i32
    %c0_i32_0 = arith.constant 0 : i32
    return %arg0, %c0_i32 : i32, i32
  }
}

</mosaic_0001>

<bundles_post_ra>
// kernel: tpu_custom_call.1
= control target key start
LH: loop header
LB: loop body
LE: loop exit
PB: predicated region body
PF: predicated region fallthrough
CT: control target
= control target key end

     0   :  { %11 = vsyncpa [#allocation5], 0  ;;  %s2797_s0 = inlined_call_operand.hbm [shape: bf16[1,64,128], index: 0, kind: input, shape index: {}]   ;;  %s2798_s1 = inlined_call_operand.hbm [shape: bf16[128,512], index: 1, kind: input, shape index: {}]   ;;  %s2799_s2 = inlined_call_operand.hbm [shape: bf16[128,512], index: 2, kind: input, shape index: {}]   ;;  %s2800_s3 = inlined_call_operand.vmem [shape: f32[1,512], index: 3, kind: input, shape index: {}]   ;;  %s2801_s4 = inlined_call_operand.hbm [shape: f32[128,128], index: 4, kind: input, shape index: {}]   ;;  %s2802_s5 = inlined_call_operand.vmem [shape: f32[1,128], index: 5, kind: input, shape index: {}]   ;;  %s2803_s6 = inlined_call_operand.hbm [shape: f32[8,128], index: 6, kind: output, shape index: {}]  }
   0x1   :  { %12 = vsyncpa [#allocation8], 0 }
   0x2   :  { %13 = vsyncpa [#allocation11], 0 }
   0x3   :  { %14 = vsyncpa [#allocation6], 0  ;;  %s2204_s21 = smov [#allocation7]  }
   0x4   :  { %s32_s22 = sshll.u32 %s2204_s21, 4  ;;  %s33_s22 = int_to_ptr.vmem [resolvable:$true] %s32_s22 }
   0x5   :  { %s2104_s23 = scalar_lea.vmem %s33_s22, 4096  ;;  %p2109_p1 = scmp.lt.s32.totalorder %s33_s22, %s33_s22 }
   0x6   :  { %p2105_p0 = scmp.ne.s32.totalorder %s33_s22, %s2104_s23  ;;  %p2110_p2 = scmp.lt.s32.totalorder %s2104_s23, %s2104_s23 }
   0x8   :  { %p2111_p3 = por %p2110_p2, %p2109_p1 }
   0xa   :  { %p2112_p4 = pnand %p2111_p3, %p2105_p0 }
   0xc   :  { %2115 = shalt.err (!%p2112_p4)
}
   0xd   :  { %s2205_s24 = smov 256   ;;  %s2206_s25 = smov 16  }
   0xe   :  { %38 = dma.hbm_to_vmem [thread:$0]  %s2798_s1, 4096, %s33_s22, [#allocation8], %s2205_s24, %s2205_s24, %s2206_s25  }
   0xf   :  { %s2207_s28 = smov [#allocation4]  }
  0x10   :  { %s20_s29 = sshll.u32 %s2207_s28, 4  ;;  %s21_s29 = int_to_ptr.vmem [resolvable:$true] %s20_s29 }
  0x11   :  { %s2124_s30 = scalar_lea.vmem %s21_s29, 512  ;;  %p2129_p6 = scmp.lt.s32.totalorder %s21_s29, %s21_s29 }
  0x12   :  { %p2125_p5 = scmp.ne.s32.totalorder %s21_s29, %s2124_s30  ;;  %p2130_p7 = scmp.lt.s32.totalorder %s2124_s30, %s2124_s30 }
  0x14   :  { %p2131_p8 = por %p2130_p7, %p2129_p6 }
  0x16   :  { %p2132_p9 = pnand %p2131_p8, %p2125_p5 }
  0x18   :  { %2135 = shalt.err (!%p2132_p9)
}
  0x19   :  { %s2208_s7 = smov 64   ;;  %s2209_s8 = smov 4  }
  0x1a   :  { %26 = dma.hbm_to_vmem [thread:$0]  %s2797_s0, 512, %s21_s29, [#allocation5], %s2208_s7, %s2208_s7, %s2209_s8  }
  0x1b   :  { %s2210_s11 = smov [#allocation9]   ;;  %s2211_s13 = smov [#allocation10]  }
  0x1c   :  { %s44_s12 = sshll.u32 %s2210_s11, 4  ;;  %s58_s1 = sshll.u32 %s2211_s13, 4  ;;  %s45_s12 = int_to_ptr.vmem [resolvable:$true] %s44_s12  ;;  %s59_s1 = int_to_ptr.vmem [resolvable:$true] %s58_s1 }
  0x1d   :  { %s2144_s14 = scalar_lea.vmem %s45_s12, 4096  ;;  %p2149_p11 = scmp.lt.s32.totalorder %s45_s12, %s45_s12 }
  0x1e   :  { %p2145_p10 = scmp.ne.s32.totalorder %s45_s12, %s2144_s14  ;;  %p2150_p12 = scmp.lt.s32.totalorder %s2144_s14, %s2144_s14 }
  0x20   :  { %p2151_p13 = por %p2150_p12, %p2149_p11 }
  0x22   :  { %p2152_p0 = pnand %p2151_p13, %p2145_p10 }
  0x24   :  { %2155 = shalt.err (!%p2152_p0)
}
  0x25   :  { %50 = dma.hbm_to_vmem [thread:$0]  %s2799_s2, 4096, %s45_s12, [#allocation8], %s2205_s24, %s2205_s24, %s2206_s25  }
  0x26   :  { %s2164_s0 = scalar_lea.vmem %s59_s1, 2048  ;;  %p2169_p2 = scmp.lt.s32.totalorder %s59_s1, %s59_s1 }
  0x27   :  { %p2165_p1 = scmp.ne.s32.totalorder %s59_s1, %s2164_s0  ;;  %p2170_p3 = scmp.lt.s32.totalorder %s2164_s0, %s2164_s0 }
  0x29   :  { %p2171_p4 = por %p2170_p3, %p2169_p2 }
  0x2b   :  { %p2172_p5 = pnand %p2171_p4, %p2165_p1 }
  0x2d   :  { %2175 = shalt.err (!%p2172_p5)
}
  0x2e   :  { %s2212_s17 = smov 128   ;;  %s2213_s18 = smov 8  }
  0x2f   :  { %64 = dma.hbm_to_vmem [thread:$0]  %s2801_s4, 2048, %s59_s1, [#allocation11], %s2212_s17, %s2212_s17, %s2213_s18  }
  0x30   :  { %2196 = dma.done.wait [#allocation5], 512  }
  0x31   :  { %2197 = vsyncadd [#allocation5], 4294966784 }
  0x32   :  { %2198 = dma.done.wait [#allocation8], 8192  }
  0x33   :  { %2199 = vsyncadd [#allocation8], 4294959104 }
  0x34   :  { %2200 = dma.done.wait [#allocation11], 2048  }
  0x35   :  { %2201 = vsyncadd [#allocation11], 4294965248  ;;  %v2804_v0 = vmov 0   ;;  %v1836_v1 = vld [vmem:[#allocation7 + $0xe4] ss:$16 sps:$4 sm:$0xff]   ;;  %v1897_v44 = vld [vmem:[#allocation4 + $0x8] sm:$0xff]  }
  0x36   :  { %364 = vmatprep.mubr.bf16.mxu0 %v2804_v0  ;;  %437 = vmatprep.mubr.bf16.mxu1 %v2804_v0  ;;  %v1838_v2 = vld [vmem:[#allocation7 + $0xec] ss:$16 sps:$4 sm:$0xff]   ;;  %v1840_v3 = vld [vmem:[#allocation7 + $0xe0] ss:$16 sps:$4 sm:$0xff]   ;;  %v1841_v4 = vld [vmem:[#allocation7 + $0xe8] ss:$16 sps:$4 sm:$0xff]  }
  0x37   :  { %332 = vmatprep.subr.bf16.mxu0 %v1836_v1  ;;  %405 = vmatprep.subr.bf16.mxu1 %v1838_v2  ;;  %v1842_v5 = vld [vmem:[#allocation7 + $0xc4] ss:$16 sps:$4 sm:$0xff]   ;;  %v1844_v6 = vld [vmem:[#allocation7 + $0xcc] ss:$16 sps:$4 sm:$0xff]   ;;  %v1846_v7 = vld [vmem:[#allocation7 + $0xc0] ss:$16 sps:$4 sm:$0xff]  }
  0x38   :  { %333 = vmatpush1.bf16.msra.mxu0 %v1840_v3  ;;  %406 = vmatpush1.bf16.msra.mxu1 %v1841_v4  ;;  %v1847_v8 = vld [vmem:[#allocation7 + $0xc8] ss:$16 sps:$4 sm:$0xff]   ;;  %v1848_v9 = vld [vmem:[#allocation7 + $0xa4] ss:$16 sps:$4 sm:$0xff]   ;;  %v1850_v10 = vld [vmem:[#allocation7 + $0xac] ss:$16 sps:$4 sm:$0xff]  }
  0x39   :  { %334 = vmatprep.subr.bf16.mxu0 %v1842_v5  ;;  %407 = vmatprep.subr.bf16.mxu1 %v1844_v6  ;;  %v1852_v11 = vld [vmem:[#allocation7 + $0xa0] ss:$16 sps:$4 sm:$0xff]   ;;  %v1853_v12 = vld [vmem:[#allocation7 + $0xa8] ss:$16 sps:$4 sm:$0xff]   ;;  %v1854_v13 = vld [vmem:[#allocation7 + $0x84] ss:$16 sps:$4 sm:$0xff]  }
  0x3a   :  { %v1856_v14 = vld [vmem:[#allocation7 + $0x8c] ss:$16 sps:$4 sm:$0xff]   ;;  %v1858_v15 = vld [vmem:[#allocation7 + $0x80] ss:$16 sps:$4 sm:$0xff]   ;;  %v1859_v16 = vld [vmem:[#allocation7 + $0x88] ss:$16 sps:$4 sm:$0xff]  }
  0x3b   :  { %v1860_v17 = vld [vmem:[#allocation7 + $0x64] ss:$16 sps:$4 sm:$0xff]   ;;  %v1862_v18 = vld [vmem:[#allocation7 + $0x6c] ss:$16 sps:$4 sm:$0xff]   ;;  %v1864_v19 = vld [vmem:[#allocation7 + $0x60] ss:$16 sps:$4 sm:$0xff]  }
  0x3c   :  { %335 = vmatpush1.bf16.msra.mxu0 %v1846_v7  ;;  %408 = vmatpush1.bf16.msra.mxu1 %v1847_v8  ;;  %v1865_v20 = vld [vmem:[#allocation7 + $0x68] ss:$16 sps:$4 sm:$0xff]   ;;  %v1866_v21 = vld [vmem:[#allocation7 + $0x44] ss:$16 sps:$4 sm:$0xff]   ;;  %v1868_v22 = vld [vmem:[#allocation7 + $0x4c] ss:$16 sps:$4 sm:$0xff]   ;;  %v128_v7 = vlaneseq }
  0x3d   :  { %336 = vmatprep.subr.bf16.mxu0 %v1848_v9  ;;  %409 = vmatprep.subr.bf16.mxu1 %v1850_v10  ;;  %v1870_v23 = vld [vmem:[#allocation7 + $0x40] ss:$16 sps:$4 sm:$0xff]   ;;  %v1871_v24 = vld [vmem:[#allocation7 + $0x48] ss:$16 sps:$4 sm:$0xff]   ;;  %v1872_v25 = vld [vmem:[#allocation7 + $0x24] ss:$16 sps:$4 sm:$0xff]  }
  0x3e   :  { %v1874_v26 = vld [vmem:[#allocation7 + $0x2c] ss:$16 sps:$4 sm:$0xff]   ;;  %v1876_v27 = vld [vmem:[#allocation7 + $0x20] ss:$16 sps:$4 sm:$0xff]   ;;  %v1877_v28 = vld [vmem:[#allocation7 + $0x28] ss:$16 sps:$4 sm:$0xff]  }
  0x3f   :  { %v1878_v29 = vld [vmem:[#allocation7 + $0x4] ss:$16 sps:$4 sm:$0xff]   ;;  %v1880_v30 = vld [vmem:[#allocation7 + $0xc] ss:$16 sps:$4 sm:$0xff]   ;;  %v1882_v31 = vld [vmem:[#allocation7] ss:$16 sps:$4 sm:$0xff]  }
  0x40   :  { %337 = vmatpush1.bf16.msra.mxu0 %v1852_v11  ;;  %410 = vmatpush1.bf16.msra.mxu1 %v1853_v12  ;;  %v1883_v32 = vld [vmem:[#allocation7 + $0x8] ss:$16 sps:$4 sm:$0xff]   ;;  %v2274_v33 = vld [vmem:[#allocation9 + $0xe4] ss:$16 sps:$4 sm:$0xff]   ;;  %v2276_v34 = vld [vmem:[#allocation9 + $0xec] ss:$16 sps:$4 sm:$0xff]  }
  0x41   :  { %338 = vmatprep.subr.bf16.mxu0 %v1854_v13  ;;  %411 = vmatprep.subr.bf16.mxu1 %v1856_v14  ;;  %v1884_v35 = vld [vmem:[#allocation4] sm:$0xff]   ;;  %v2280_v37 = vld [vmem:[#allocation9 + $0xe8] ss:$16 sps:$4 sm:$0xff]   ;;  %v2286_v39 = vld [vmem:[#allocation9 + $0xcc] ss:$16 sps:$4 sm:$0xff]   ;;  %v2215_v6 = vmov 0.0|0.0  }
  0x42   :  { %v2278_v36 = vld [vmem:[#allocation9 + $0xe0] ss:$16 sps:$4 sm:$0xff]   ;;  %v2284_v38 = vld [vmem:[#allocation9 + $0xc4] ss:$16 sps:$4 sm:$0xff]   ;;  %v2292_v41 = vld [vmem:[#allocation9 + $0xc8] ss:$16 sps:$4 sm:$0xff]  }
  0x43   :  { %v2288_v40 = vld [vmem:[#allocation9 + $0xc0] ss:$16 sps:$4 sm:$0xff]   ;;  %v2296_v42 = vld [vmem:[#allocation9 + $0xa4] ss:$16 sps:$4 sm:$0xff]   ;;  %v2298_v43 = vld [vmem:[#allocation9 + $0xac] ss:$16 sps:$4 sm:$0xff]  }
  0x44   :  { %339 = vmatpush1.bf16.msra.mxu0 %v1858_v15  ;;  %412 = vmatpush1.bf16.msra.mxu1 %v1859_v16  ;;  %v2302_v45 = vld [vmem:[#allocation9 + $0xa0] ss:$16 sps:$4 sm:$0xff]   ;;  %v2304_v46 = vld [vmem:[#allocation9 + $0xa8] ss:$16 sps:$4 sm:$0xff]   ;;  %v2308_v47 = vld [vmem:[#allocation9 + $0x84] ss:$16 sps:$4 sm:$0xff]  }
  0x45   :  { %340 = vmatprep.subr.bf16.mxu0 %v1860_v17  ;;  %413 = vmatprep.subr.bf16.mxu1 %v1862_v18  ;;  %v2312_v48 = vld [vmem:[#allocation9 + $0x8c] ss:$16 sps:$4 sm:$0xff]   ;;  %v2314_v49 = vld [vmem:[#allocation9 + $0x80] ss:$16 sps:$4 sm:$0xff]   ;;  %v2316_v50 = vld [vmem:[#allocation9 + $0x88] ss:$16 sps:$4 sm:$0xff]  }
  0x46   :  { %v2320_v51 = vld [vmem:[#allocation9 + $0x64] ss:$16 sps:$4 sm:$0xff]   ;;  %v2324_v52 = vld [vmem:[#allocation9 + $0x6c] ss:$16 sps:$4 sm:$0xff]   ;;  %v2330_v54 = vld [vmem:[#allocation9 + $0x60] ss:$16 sps:$4 sm:$0xff]  }
  0x47   :  { %v1910_v53 = vld [vmem:[#allocation4 + $0x10] sm:$0xff]   ;;  %v2332_v55 = vld [vmem:[#allocation9 + $0x68] ss:$16 sps:$4 sm:$0xff]   ;;  %v2338_v57 = vld [vmem:[#allocation9 + $0x4c] ss:$16 sps:$4 sm:$0xff]   ;;  %v129_v8 = vshrl.u32 %v128_v7, 7 }
  0x48   :  { %341 = vmatpush1.bf16.msra.mxu0 %v1864_v19  ;;  %414 = vmatpush1.bf16.msra.mxu1 %v1865_v20  ;;  %v2336_v56 = vld [vmem:[#allocation9 + $0x44] ss:$16 sps:$4 sm:$0xff]   ;;  %v2342_v58 = vld [vmem:[#allocation9 + $0x40] ss:$16 sps:$4 sm:$0xff]   ;;  %v2344_v59 = vld [vmem:[#allocation9 + $0x48] ss:$16 sps:$4 sm:$0xff]  }
  0x49   :  { %342 = vmatprep.subr.bf16.mxu0 %v1866_v21  ;;  %415 = vmatprep.subr.bf16.mxu1 %v1868_v22  ;;  %v2348_v60 = vld [vmem:[#allocation9 + $0x24] ss:$16 sps:$4 sm:$0xff]   ;;  %v2350_v61 = vld [vmem:[#allocation9 + $0x2c] ss:$16 sps:$4 sm:$0xff]   ;;  %v2356_v63 = vld [vmem:[#allocation9 + $0x20] ss:$16 sps:$4 sm:$0xff]  }
  0x4a   :  { %v1923_v62 = vld [vmem:[#allocation4 + $0x18] sm:$0xff]   ;;  %v2362_v2 = vld [vmem:[#allocation9 + $0x4] ss:$16 sps:$4 sm:$0xff]   ;;  %v2368_v4 = vld [vmem:[#allocation9] ss:$16 sps:$4 sm:$0xff]   ;;  %v138_v9 = vsub.s32 2, %v129_v8 }
  0x4b   :  { %v2358_v1 = vld [vmem:[#allocation9 + $0x28] ss:$16 sps:$4 sm:$0xff]   ;;  %v2364_v3 = vld [vmem:[#allocation9 + $0xc] ss:$16 sps:$4 sm:$0xff]   ;;  %v130_v10 = vsub.s32 0, %v129_v8  ;;  %v142_v11 = vsub.s32 3, %v129_v8 }
  0x4c   :  { %343 = vmatpush1.bf16.msra.mxu0 %v1870_v23  ;;  %416 = vmatpush1.bf16.msra.mxu1 %v1871_v24  ;;  %v2370_v5 = vld [vmem:[#allocation9 + $0x8] ss:$16 sps:$4 sm:$0xff]   ;;  %v126_v12 = vld [vmem:[%s2800_s3] sm:$0xf]  ;;  %v134_v16 = vsub.s32 1, %v129_v8  ;;  %vm2217_vm0 = vmmov 0  }
  0x4d   :  { %344 = vmatprep.subr.bf16.mxu0 %v1872_v25  ;;  %417 = vmatprep.subr.bf16.mxu1 %v1874_v26  ;;  %v2421_v15 = vrot.slane %v126_v12, %v138_v9  ;;  %v131_v19 = vrot.slane %v126_v12, %v130_v10  ;;  %v2427_v20 = vrot.slane %v126_v12, %v142_v11  ;;  %s2218_s22 = smov [#allocation12]  }
  0x4e   :  { %v135_v23 = vrot.slane %v126_v12, %v134_v16  ;;  %s1665_s23 = sshll.u32 %s2218_s22, 4  ;;  %s1666_s23 = int_to_ptr.vmem [resolvable:$true] %s1665_s23 }
  0x4f   :  { %s2176_s24 = scalar_lea.vmem %s1666_s23, 128  ;;  %p2181_p7 = scmp.lt.s32.totalorder %s1666_s23, %s1666_s23 }
  0x50   :  { %345 = vmatpush1.bf16.msra.mxu0 %v1876_v27  ;;  %418 = vmatpush1.bf16.msra.mxu1 %v1877_v28  ;;  %p2177_p6 = scmp.ne.s32.totalorder %s1666_s23, %s2176_s24  ;;  %p2182_p8 = scmp.lt.s32.totalorder %s2176_s24, %s2176_s24 }
  0x51   :  { %346 = vmatprep.subr.bf16.mxu0 %v1878_v29  ;;  %419 = vmatprep.subr.bf16.mxu1 %v1880_v30 }
  0x52   :  { %p2183_p9 = por %p2182_p8, %p2181_p7 }
  0x54   :  { %347 = vmatpush1.bf16.msra.mxu0 %v1882_v31  ;;  %420 = vmatpush1.bf16.msra.mxu1 %v1883_v32  ;;  %p2184_p10 = pnand %p2183_p9, %p2177_p6 }
  0x55   :  { %673 = vmatprep.subr.bf16.mxu0 %v2274_v33  ;;  %714 = vmatprep.subr.bf16.mxu1 %v2276_v34 }
  0x57   :  { %365 = vmatmul.mubr.bf16.vlgmr.msra.gmra.mxu0 %v1884_v35  ;;  %438 = vmatmul.mubr.bf16.vlgmr.msra.gmra.mxu1 %v1884_v35 }
  0x58   :  { %674 = vmatpush1.bf16.msra.mxu0 %v2278_v36  ;;  %715 = vmatpush1.bf16.msra.mxu1 %v2280_v37 }
  0x59   :  { %675 = vmatprep.subr.bf16.mxu0 %v2284_v38  ;;  %716 = vmatprep.subr.bf16.mxu1 %v2286_v39 }
  0x5a   :  { %374 = vmatprep.mubr.bf16.mxu0 %v2804_v0  ;;  %447 = vmatprep.mubr.bf16.mxu1 %v2804_v0 }
  0x5c   :  { %676 = vmatpush1.bf16.msra.mxu0 %v2288_v40  ;;  %717 = vmatpush1.bf16.msra.mxu1 %v2292_v41 }
  0x5d   :  { %677 = vmatprep.subr.bf16.mxu0 %v2296_v42  ;;  %718 = vmatprep.subr.bf16.mxu1 %v2298_v43 }
  0x5f   :  { %375 = vmatmul.mubr.bf16.gmra.mxu0 %v1897_v44  ;;  %448 = vmatmul.mubr.bf16.gmra.mxu1 %v1897_v44 }
  0x60   :  { %678 = vmatpush1.bf16.msra.mxu0 %v2302_v45  ;;  %719 = vmatpush1.bf16.msra.mxu1 %v2304_v46 }
  0x61   :  { %679 = vmatprep.subr.bf16.mxu0 %v2308_v47  ;;  %720 = vmatprep.subr.bf16.mxu1 %v2312_v48 }
  0x62   :  { %384 = vmatprep.mubr.bf16.mxu0 %v2804_v0  ;;  %457 = vmatprep.mubr.bf16.mxu1 %v2804_v0 }
  0x64   :  { %680 = vmatpush1.bf16.msra.mxu0 %v2314_v49  ;;  %721 = vmatpush1.bf16.msra.mxu1 %v2316_v50 }
  0x65   :  { %681 = vmatprep.subr.bf16.mxu0 %v2320_v51  ;;  %722 = vmatprep.subr.bf16.mxu1 %v2324_v52 }
  0x67   :  { %385 = vmatmul.mubr.bf16.gmra.mxu0 %v1910_v53  ;;  %458 = vmatmul.mubr.bf16.gmra.mxu1 %v1910_v53 }
  0x68   :  { %682 = vmatpush1.bf16.msra.mxu0 %v2330_v54  ;;  %723 = vmatpush1.bf16.msra.mxu1 %v2332_v55 }
  0x69   :  { %683 = vmatprep.subr.bf16.mxu0 %v2336_v56  ;;  %724 = vmatprep.subr.bf16.mxu1 %v2338_v57 }
  0x6a   :  { %394 = vmatprep.mubr.bf16.mxu0 %v2804_v0  ;;  %467 = vmatprep.mubr.bf16.mxu1 %v2804_v0 }
  0x6c   :  { %684 = vmatpush1.bf16.msra.mxu0 %v2342_v58  ;;  %725 = vmatpush1.bf16.msra.mxu1 %v2344_v59 }
  0x6d   :  { %685 = vmatprep.subr.bf16.mxu0 %v2348_v60  ;;  %726 = vmatprep.subr.bf16.mxu1 %v2350_v61 }
  0x6f   :  { %395 = vmatmul.mubr.bf16.gmra.mxu0 %v1923_v62  ;;  %468 = vmatmul.mubr.bf16.gmra.mxu1 %v1923_v62 }
  0x70   :  { %686 = vmatpush1.bf16.msra.mxu0 %v2356_v63  ;;  %727 = vmatpush1.bf16.msra.mxu1 %v2358_v1 }
  0x71   :  { %687 = vmatprep.subr.bf16.mxu0 %v2362_v2  ;;  %728 = vmatprep.subr.bf16.mxu1 %v2364_v3 }
  0x72   :  { %705 = vmatprep.mubr.bf16.mxu0 %v2804_v0  ;;  %746 = vmatprep.mubr.bf16.mxu1 %v2804_v0 }
  0x74   :  { %688 = vmatpush1.bf16.msra.mxu0 %v2368_v4  ;;  %729 = vmatpush1.bf16.msra.mxu1 %v2370_v5 }
  0x75   :  { %784 = vmatprep.subr.bf16.mxu0 %v2274_v33  ;;  %825 = vmatprep.subr.bf16.mxu1 %v2276_v34 }
  0x77   :  { %706 = vmatmul.mubr.bf16.vlgmr.msra.gmra.mxu0 %v2215_v6  ;;  %747 = vmatmul.mubr.bf16.vlgmr.msra.gmra.mxu1 %v2215_v6 }
  0x78   :  { %785 = vmatpush1.bf16.msra.mxu0 %v2278_v36  ;;  %826 = vmatpush1.bf16.msra.mxu1 %v2280_v37 }
  0x79   :  { %786 = vmatprep.subr.bf16.mxu0 %v2284_v38  ;;  %827 = vmatprep.subr.bf16.mxu1 %v2286_v39 }
  0x7a   :  { %816 = vmatprep.mubr.bf16.mxu0 %v2804_v0  ;;  %857 = vmatprep.mubr.bf16.mxu1 %v2804_v0 }
  0x7c   :  { %787 = vmatpush1.bf16.msra.mxu0 %v2288_v40  ;;  %828 = vmatpush1.bf16.msra.mxu1 %v2292_v41 }
  0x7d   :  { %788 = vmatprep.subr.bf16.mxu0 %v2296_v42  ;;  %829 = vmatprep.subr.bf16.mxu1 %v2298_v43 }
  0x80   :  { %789 = vmatpush1.bf16.msra.mxu0 %v2302_v45  ;;  %830 = vmatpush1.bf16.msra.mxu1 %v2304_v46 }
  0x81   :  { %790 = vmatprep.subr.bf16.mxu0 %v2308_v47  ;;  %831 = vmatprep.subr.bf16.mxu1 %v2312_v48 }
  0x84   :  { %791 = vmatpush1.bf16.msra.mxu0 %v2314_v49  ;;  %832 = vmatpush1.bf16.msra.mxu1 %v2316_v50 }
  0x85   :  { %792 = vmatprep.subr.bf16.mxu0 %v2320_v51  ;;  %833 = vmatprep.subr.bf16.mxu1 %v2324_v52 }
  0x88   :  { %793 = vmatpush1.bf16.msra.mxu0 %v2330_v54  ;;  %834 = vmatpush1.bf16.msra.mxu1 %v2332_v55 }
  0x89   :  { %794 = vmatprep.subr.bf16.mxu0 %v2336_v56  ;;  %835 = vmatprep.subr.bf16.mxu1 %v2338_v57 }
  0x8c   :  { %795 = vmatpush1.bf16.msra.mxu0 %v2342_v58  ;;  %836 = vmatpush1.bf16.msra.mxu1 %v2344_v59 }
  0x8d   :  { %796 = vmatprep.subr.bf16.mxu0 %v2348_v60  ;;  %837 = vmatprep.subr.bf16.mxu1 %v2350_v61 }
  0x90   :  { %797 = vmatpush1.bf16.msra.mxu0 %v2356_v63  ;;  %838 = vmatpush1.bf16.msra.mxu1 %v2358_v1 }
  0x91   :  { %798 = vmatprep.subr.bf16.mxu0 %v2362_v2  ;;  %839 = vmatprep.subr.bf16.mxu1 %v2364_v3 }
  0x94   :  { %799 = vmatpush1.bf16.msra.mxu0 %v2368_v4  ;;  %840 = vmatpush1.bf16.msra.mxu1 %v2370_v5 }
  0x95   :  { %895 = vmatprep.subr.bf16.mxu0 %v2274_v33  ;;  %936 = vmatprep.subr.bf16.mxu1 %v2276_v34 }
 0x117   :  { %v2417_v13 = vpop.f32.mrf.mxu0  ;;  %v2419_v14 = vpop.f32.mrf.mxu1 }
 0x119   :  { %v2423_v17 = vpop.f32.mrf.mxu0  ;;  %v2425_v18 = vpop.f32.mrf.mxu1 }
 0x11b   :  { %v370_v21 = vpop.f32.mrf.mxu0  ;;  %v443_v22 = vpop.f32.mrf.mxu1 }
 0x11c   :  { %v2429_v24 = vadd.f32 %v370_v21, %v131_v19  ;;  %v2432_v25 = vadd.f32 %v443_v22, %v2421_v15 }
 0x11d   :  { %v372_v26 = vpop.f32.mrf.mxu0  ;;  %v445_v27 = vpop.f32.mrf.mxu1 }
 0x11e   :  { %v2434_v28 = vadd.f32 %v372_v26, %v135_v23  ;;  %v2437_v29 = vadd.f32 %v445_v27, %v2427_v20 }
 0x11f   :  { %v376_v30 = vpop.f32.mrf.mxu0  ;;  %v449_v31 = vpop.f32.mrf.mxu1 }
 0x120   :  { %v2439_v32 = vadd.f32 %v376_v30, %v131_v19  ;;  %v2442_v35 = vadd.f32 %v449_v31, %v2421_v15 }
 0x121   :  { %v378_v44 = vpop.f32.mrf.mxu0  ;;  %v451_v53 = vpop.f32.mrf.mxu1 }
 0x122   :  { %2806 = vst [vmem:[#allocation17_spill] sm:$0xff] %v2442_v35  ;;  %v2444_v62 = vadd.f32 %v378_v44, %v135_v23  ;;  %v2447_v6 = vadd.f32 %v451_v53, %v2427_v20 }
 0x123   :  { %v380_v7 = vpop.f32.mrf.mxu0  ;;  %v453_v8 = vpop.f32.mrf.mxu1 }
 0x124   :  { %v2449_v9 = vadd.f32 %v380_v7, %v131_v19  ;;  %v2452_v10 = vadd.f32 %v453_v8, %v2421_v15 }
 0x125   :  { %v382_v11 = vpop.f32.mrf.mxu0  ;;  %v455_v12 = vpop.f32.mrf.mxu1 }
 0x126   :  { %2807 = vst [vmem:[#allocation18_spill] sm:$0xff] %v2449_v9  ;;  %2808 = vst [vmem:[#allocation19_spill] sm:$0xff] %v2452_v10  ;;  %v2454_v16 = vadd.f32 %v382_v11, %v135_v23  ;;  %v2457_v21 = vadd.f32 %v455_v12, %v2427_v20 }
 0x127   :  { %v386_v22 = vpop.f32.mrf.mxu0  ;;  %v459_v26 = vpop.f32.mrf.mxu1 }
 0x128   :  { %2809 = vst [vmem:[#allocation20_spill] sm:$0xff] %v2454_v16  ;;  %2810 = vst [vmem:[#allocation21_spill] sm:$0xff] %v2457_v21  ;;  %v2459_v27 = vadd.f32 %v386_v22, %v131_v19  ;;  %v2462_v30 = vadd.f32 %v459_v26, %v2421_v15 }
 0x129   :  { %v388_v31 = vpop.f32.mrf.mxu0  ;;  %v461_v44 = vpop.f32.mrf.mxu1 }
 0x12a   :  { %2811 = vst [vmem:[#allocation22_spill] sm:$0xff] %v2459_v27  ;;  %2812 = vst [vmem:[#allocation23_spill] sm:$0xff] %v2462_v30  ;;  %v2464_v53 = vadd.f32 %v388_v31, %v135_v23  ;;  %v2467_v7 = vadd.f32 %v461_v44, %v2427_v20 }
 0x12b   :  { %v390_v8 = vpop.f32.mrf.mxu0  ;;  %v463_v11 = vpop.f32.mrf.mxu1 }
 0x12c   :  { %2813 = vst [vmem:[#allocation24_spill] sm:$0xff] %v2464_v53  ;;  %2814 = vst [vmem:[#allocation25_spill] sm:$0xff] %v2467_v7  ;;  %v2469_v0 = vadd.f32 %v390_v8, %v131_v19  ;;  %v2472_v12 = vadd.f32 %v463_v11, %v2421_v15 }
 0x12d   :  { %v392_v10 = vpop.f32.mrf.mxu0  ;;  %v465_v22 = vpop.f32.mrf.mxu1 }
 0x12e   :  { %2815 = vst [vmem:[#allocation26_spill] sm:$0xff] %v2469_v0  ;;  %2816 = vst [vmem:[#allocation27_spill] sm:$0xff] %v2472_v12  ;;  %v2474_v27 = vadd.f32 %v392_v10, %v135_v23  ;;  %v2477_v26 = vadd.f32 %v465_v22, %v2427_v20 }
 0x12f   :  { %v396_v30 = vpop.f32.mrf.mxu0  ;;  %v469_v31 = vpop.f32.mrf.mxu1 }
 0x130   :  { %2817 = vst [vmem:[#allocation28_spill] sm:$0xff] %v2474_v27  ;;  %2818 = vst [vmem:[#allocation29_spill] sm:$0xff] %v2477_v26  ;;  %v2479_v53 = vadd.f32 %v396_v30, %v131_v19  ;;  %v2482_v44 = vadd.f32 %v469_v31, %v2421_v15 }
 0x131   :  { %v398_v7 = vpop.f32.mrf.mxu0  ;;  %v471_v8 = vpop.f32.mrf.mxu1 }
 0x132   :  { %2819 = vst [vmem:[#allocation30_spill] sm:$0xff] %v2479_v53  ;;  %2820 = vst [vmem:[#allocation31_spill] sm:$0xff] %v2482_v44  ;;  %v2484_v0 = vadd.f32 %v398_v7, %v135_v23  ;;  %v2487_v11 = vadd.f32 %v471_v8, %v2427_v20  ;;  %v367_v53 = vadd.f32 %v2417_v13, %v131_v19 }
 0x133   :  { %v400_v12 = vpop.f32.mrf.mxu0  ;;  %v473_v10 = vpop.f32.mrf.mxu1  ;;  %v369_v8 = vadd.f32 %v2423_v17, %v135_v23 }
 0x134   :  { %2821 = vst [vmem:[#allocation32_spill] sm:$0xff] %v2484_v0  ;;  %2822 = vst [vmem:[#allocation33_spill] sm:$0xff] %v2487_v11  ;;  %v2489_v27 = vadd.f32 %v400_v12, %v131_v19  ;;  %v2492_v22 = vadd.f32 %v473_v10, %v2421_v15  ;;  %v442_v19 = vadd.f32 %v2425_v18, %v2427_v20 }
 0x135   :  { %v402_v26 = vpop.f32.mrf.mxu0  ;;  %v475_v30 = vpop.f32.mrf.mxu1 }
 0x136   :  { %2823 = vst [vmem:[#allocation34_spill] sm:$0xff] %v2489_v27  ;;  %2824 = vst [vmem:[#allocation35_spill] sm:$0xff] %v2492_v22  ;;  %v2495_v31 = vadd.f32 %v402_v26, %v135_v23  ;;  %v2498_v44 = vadd.f32 %v475_v30, %v2427_v20  ;;  %v440_v30 = vadd.f32 %v2419_v14, %v2421_v15 }
 0x137   :  { %v707_v7 = vpop.f32.mrf.mxu0  ;;  %v748_v0 = vpop.f32.mrf.mxu1 }
 0x138   :  { %v755_v11 = vadd.f32 %v707_v7, %v367_v53  ;;  %v757_v53 = vadd.f32 %v748_v0, %v440_v30 }
 0x139   :  { %v709_v21 = vpop.f32.mrf.mxu0  ;;  %v750_v12 = vpop.f32.mrf.mxu1 }
 0x13a   :  { %v1744_v27 = vmul.f32 -1.442695, %v755_v11  ;;  %v756_v16 = vadd.f32 %v709_v21, %v369_v8  ;;  %v758_v26 = vadd.f32 %v750_v12, %v442_v19 }
 0x13b   :  { %v711_v10 = vpop.f32.mrf.mxu0  ;;  %v752_v22 = vpop.f32.mrf.mxu1 }
 0x13c   :  { %1936 = vpow2.f32 %v1744_v27  ;;  %v1745_v9 = vmul.f32 -1.442695, %v756_v16  ;;  %v1746_v17 = vmul.f32 -1.442695, %v758_v26  ;;  %v2825_v10 = vmov 0  }
 0x13d   :  { %v712_v35 = vpop.f32.mrf.mxu0  ;;  %v753_v13 = vpop.f32.mrf.mxu1 }
 0x13e   :  { %1938 = vpow2.f32 %v1745_v9 }
 0x13f   :  { %1940 = vpow2.f32 %v1746_v17 }
 0x149   :  { %v1937_v23 = vpop.eup %1936 }
 0x14a   :  { %v762_v7 = vadd.f32 1.0, %v1937_v23 }
 0x14b   :  { %v1939_v11 = vpop.eup %1938 }
 0x14c   :  { %1942 = vrcp.f32 %v762_v7  ;;  %v768_v21 = vadd.f32 1.0, %v1939_v11  ;;  %v1941_v35 = vpop.eup %1940 }
 0x14d   :  { %1944 = vtanh.f32 %v757_v53  ;;  %v775_v22 = vadd.f32 1.0, %v1941_v35 }
 0x14e   :  { %1946 = vrcp.f32 %v768_v21 }
 0x14f   :  { %1948 = vrcp.f32 %v775_v22 }
 0x159   :  { %v1943_v16 = vpop.eup %1942 }
 0x15a   :  { %v1945_v9 = vpop.eup %1944 }
 0x15b   :  { %v1947_v27 = vpop.eup %1946  ;;  %v779_v20 = vmul.f32 %v1945_v9, %v1943_v16 }
 0x15c   :  { %v778_v18 = vmul.f32 0.0, %v1947_v27  ;;  %v1949_v0 = vpop.eup %1948 }
 0x15e   :  { %v2505_v8 = vadd.f32 %v779_v20, %v778_v18 }
 0x160   :  { %1950 = vtanh.f32 %v2505_v8 }
 0x16d   :  { %v1951_v14 = vpop.eup %1950 }
 0x16e   :  { %v782_v15 = vmul.f32 %v1951_v14, %v1949_v0 }
 0x170   :  { %v783_v12 = vpack.c.bf16 %v782_v15, %v782_v15 }
 0x172   :  { %817 = vmatmul.mubr.bf16.vlgmr.msra.gmra.mxu0 %v783_v12  ;;  %858 = vmatmul.mubr.bf16.vlgmr.msra.gmra.mxu1 %v783_v12 }
 0x173   :  { %896 = vmatpush1.bf16.msra.mxu0 %v2278_v36  ;;  %937 = vmatpush1.bf16.msra.mxu1 %v2280_v37 }
 0x174   :  { %897 = vmatprep.subr.bf16.mxu0 %v2284_v38  ;;  %938 = vmatprep.subr.bf16.mxu1 %v2286_v39 }
 0x175   :  { %927 = vmatprep.mubr.bf16.mxu0 %v2825_v10  ;;  %968 = vmatprep.mubr.bf16.mxu1 %v2825_v10 }
 0x177   :  { %898 = vmatpush1.bf16.msra.mxu0 %v2288_v40  ;;  %939 = vmatpush1.bf16.msra.mxu1 %v2292_v41 }
 0x178   :  { %899 = vmatprep.subr.bf16.mxu0 %v2296_v42  ;;  %940 = vmatprep.subr.bf16.mxu1 %v2298_v43 }
 0x17b   :  { %900 = vmatpush1.bf16.msra.mxu0 %v2302_v45  ;;  %941 = vmatpush1.bf16.msra.mxu1 %v2304_v46 }
 0x17c   :  { %901 = vmatprep.subr.bf16.mxu0 %v2308_v47  ;;  %942 = vmatprep.subr.bf16.mxu1 %v2312_v48 }
 0x17f   :  { %902 = vmatpush1.bf16.msra.mxu0 %v2314_v49  ;;  %943 = vmatpush1.bf16.msra.mxu1 %v2316_v50 }
 0x180   :  { %903 = vmatprep.subr.bf16.mxu0 %v2320_v51  ;;  %944 = vmatprep.subr.bf16.mxu1 %v2324_v52 }
 0x183   :  { %904 = vmatpush1.bf16.msra.mxu0 %v2330_v54  ;;  %945 = vmatpush1.bf16.msra.mxu1 %v2332_v55 }
 0x184   :  { %905 = vmatprep.subr.bf16.mxu0 %v2336_v56  ;;  %946 = vmatprep.subr.bf16.mxu1 %v2338_v57 }
 0x187   :  { %906 = vmatpush1.bf16.msra.mxu0 %v2342_v58  ;;  %947 = vmatpush1.bf16.msra.mxu1 %v2344_v59 }
 0x188   :  { %907 = vmatprep.subr.bf16.mxu0 %v2348_v60  ;;  %948 = vmatprep.subr.bf16.mxu1 %v2350_v61 }
 0x18b   :  { %908 = vmatpush1.bf16.msra.mxu0 %v2356_v63  ;;  %949 = vmatpush1.bf16.msra.mxu1 %v2358_v1 }
 0x18c   :  { %909 = vmatprep.subr.bf16.mxu0 %v2362_v2  ;;  %950 = vmatprep.subr.bf16.mxu1 %v2364_v3 }
 0x18f   :  { %910 = vmatpush1.bf16.msra.mxu0 %v2368_v4  ;;  %951 = vmatpush1.bf16.msra.mxu1 %v2370_v5 }
 0x190   :  { %1006 = vmatprep.subr.bf16.mxu0 %v2274_v33  ;;  %1047 = vmatprep.subr.bf16.mxu1 %v2276_v34 }
 0x232   :  { %v818_v13 = vpop.f32.mrf.mxu0  ;;  %v859_v19 = vpop.f32.mrf.mxu1 }
 0x233   :  { %v866_v26 = vadd.f32 %v818_v13, %v2429_v24  ;;  %v868_v27 = vadd.f32 %v859_v19, %v2432_v25 }
 0x234   :  { %v820_v30 = vpop.f32.mrf.mxu0  ;;  %v861_v17 = vpop.f32.mrf.mxu1 }
 0x235   :  { %v1747_v23 = vmul.f32 -1.442695, %v866_v26  ;;  %v867_v53 = vadd.f32 %v820_v30, %v2434_v28  ;;  %v869_v9 = vadd.f32 %v861_v17, %v2437_v29 }
 0x236   :  { %v822_v7 = vpop.f32.mrf.mxu0  ;;  %v863_v11 = vpop.f32.mrf.mxu1 }
 0x237   :  { %1952 = vpow2.f32 %v1747_v23  ;;  %v1748_v21 = vmul.f32 -1.442695, %v867_v53  ;;  %v1749_v22 = vmul.f32 -1.442695, %v869_v9 }
 0x238   :  { %v823_v35 = vpop.f32.mrf.mxu0  ;;  %v864_v16 = vpop.f32.mrf.mxu1 }
 0x239   :  { %1954 = vpow2.f32 %v1748_v21 }
 0x23a   :  { %1956 = vtanh.f32 %v868_v27 }
 0x23b   :  { %1958 = vpow2.f32 %v1749_v22 }
 0x244   :  { %v1953_v18 = vpop.eup %1952 }
 0x245   :  { %v873_v20 = vadd.f32 1.0, %v1953_v18 }
 0x246   :  { %v1955_v24 = vpop.eup %1954 }
 0x247   :  { %1960 = vrcp.f32 %v873_v20  ;;  %v879_v0 = vadd.f32 1.0, %v1955_v24  ;;  %v1957_v28 = vpop.eup %1956 }
 0x248   :  { %v1959_v14 = vpop.eup %1958 }
 0x249   :  { %1962 = vrcp.f32 %v879_v0  ;;  %v886_v26 = vadd.f32 1.0, %v1959_v14  ;;  %v2826_v0 = vld [vmem:[#allocation17_spill] sm:$0xff] }
 0x24b   :  { %1964 = vrcp.f32 %v886_v26 }
 0x254   :  { %v1961_v15 = vpop.eup %1960 }
 0x255   :  { %v890_v12 = vmul.f32 %v1961_v15, %v1957_v28 }
 0x256   :  { %v1963_v13 = vpop.eup %1962 }
 0x257   :  { %v889_v30 = vmul.f32 %v1963_v13, %v2505_v8 }
 0x258   :  { %v1965_v25 = vpop.eup %1964 }
 0x259   :  { %v2547_v29 = vadd.f32 %v890_v12, %v889_v30 }
 0x25b   :  { %1966 = vtanh.f32 %v2547_v29 }
 0x268   :  { %v1967_v19 = vpop.eup %1966 }
 0x269   :  { %v893_v17 = vmul.f32 %v1967_v19, %v1965_v25 }
 0x26b   :  { %v894_v23 = vpack.c.bf16 %v893_v17, %v893_v17 }
 0x26d   :  { %928 = vmatmul.mubr.bf16.vlgmr.msra.gmra.mxu0 %v894_v23  ;;  %969 = vmatmul.mubr.bf16.vlgmr.msra.gmra.mxu1 %v894_v23 }
 0x26e   :  { %1007 = vmatpush1.bf16.msra.mxu0 %v2278_v36  ;;  %1048 = vmatpush1.bf16.msra.mxu1 %v2280_v37 }
 0x26f   :  { %1008 = vmatprep.subr.bf16.mxu0 %v2284_v38  ;;  %1049 = vmatprep.subr.bf16.mxu1 %v2286_v39 }
 0x270   :  { %1038 = vmatprep.mubr.bf16.mxu0 %v2825_v10  ;;  %1079 = vmatprep.mubr.bf16.mxu1 %v2825_v10 }
 0x272   :  { %1009 = vmatpush1.bf16.msra.mxu0 %v2288_v40  ;;  %1050 = vmatpush1.bf16.msra.mxu1 %v2292_v41 }
 0x273   :  { %1010 = vmatprep.subr.bf16.mxu0 %v2296_v42  ;;  %1051 = vmatprep.subr.bf16.mxu1 %v2298_v43 }
 0x276   :  { %1011 = vmatpush1.bf16.msra.mxu0 %v2302_v45  ;;  %1052 = vmatpush1.bf16.msra.mxu1 %v2304_v46 }
 0x277   :  { %1012 = vmatprep.subr.bf16.mxu0 %v2308_v47  ;;  %1053 = vmatprep.subr.bf16.mxu1 %v2312_v48 }
 0x27a   :  { %1013 = vmatpush1.bf16.msra.mxu0 %v2314_v49  ;;  %1054 = vmatpush1.bf16.msra.mxu1 %v2316_v50 }
 0x27b   :  { %1014 = vmatprep.subr.bf16.mxu0 %v2320_v51  ;;  %1055 = vmatprep.subr.bf16.mxu1 %v2324_v52 }
 0x27e   :  { %1015 = vmatpush1.bf16.msra.mxu0 %v2330_v54  ;;  %1056 = vmatpush1.bf16.msra.mxu1 %v2332_v55 }
 0x27f   :  { %1016 = vmatprep.subr.bf16.mxu0 %v2336_v56  ;;  %1057 = vmatprep.subr.bf16.mxu1 %v2338_v57 }
 0x282   :  { %1017 = vmatpush1.bf16.msra.mxu0 %v2342_v58  ;;  %1058 = vmatpush1.bf16.msra.mxu1 %v2344_v59 }
 0x283   :  { %1018 = vmatprep.subr.bf16.mxu0 %v2348_v60  ;;  %1059 = vmatprep.subr.bf16.mxu1 %v2350_v61 }
 0x286   :  { %1019 = vmatpush1.bf16.msra.mxu0 %v2356_v63  ;;  %1060 = vmatpush1.bf16.msra.mxu1 %v2358_v1 }
 0x287   :  { %1020 = vmatprep.subr.bf16.mxu0 %v2362_v2  ;;  %1061 = vmatprep.subr.bf16.mxu1 %v2364_v3 }
 0x28a   :  { %1021 = vmatpush1.bf16.msra.mxu0 %v2368_v4  ;;  %1062 = vmatpush1.bf16.msra.mxu1 %v2370_v5 }
 0x28b   :  { %1117 = vmatprep.subr.bf16.mxu0 %v2274_v33  ;;  %1158 = vmatprep.subr.bf16.mxu1 %v2276_v34 }
 0x32d   :  { %v929_v8 = vpop.f32.mrf.mxu0  ;;  %v970_v53 = vpop.f32.mrf.mxu1 }
 0x32e   :  { %v977_v7 = vadd.f32 %v929_v8, %v2439_v32  ;;  %v979_v28 = vadd.f32 %v970_v53, %v2826_v0 }
 0x32f   :  { %v931_v11 = vpop.f32.mrf.mxu0  ;;  %v972_v21 = vpop.f32.mrf.mxu1 }
 0x330   :  { %v1750_v35 = vmul.f32 -1.442695, %v977_v7  ;;  %v978_v16 = vadd.f32 %v931_v11, %v2444_v62  ;;  %v980_v24 = vadd.f32 %v972_v21, %v2447_v6 }
 0x331   :  { %v933_v9 = vpop.f32.mrf.mxu0  ;;  %v974_v27 = vpop.f32.mrf.mxu1 }
 0x332   :  { %1968 = vpow2.f32 %v1750_v35  ;;  %v1751_v22 = vmul.f32 -1.442695, %v978_v16  ;;  %v1752_v14 = vmul.f32 -1.442695, %v980_v24  ;;  %v2827_v35 = vld [vmem:[#allocation18_spill] sm:$0xff] }
 0x333   :  { %v934_v18 = vpop.f32.mrf.mxu0  ;;  %v975_v20 = vpop.f32.mrf.mxu1 }
 0x334   :  { %1970 = vpow2.f32 %v1751_v22  ;;  %v2828_v18 = vld [vmem:[#allocation20_spill] sm:$0xff] }
 0x335   :  { %1972 = vtanh.f32 %v979_v28 }
 0x336   :  { %1974 = vpow2.f32 %v1752_v14 }
 0x33f   :  { %v1969_v15 = vpop.eup %1968 }
 0x340   :  { %v984_v12 = vadd.f32 1.0, %v1969_v15 }
 0x341   :  { %v1971_v32 = vpop.eup %1970 }
 0x342   :  { %1976 = vrcp.f32 %v984_v12  ;;  %v990_v13 = vadd.f32 1.0, %v1971_v32  ;;  %v1973_v62 = vpop.eup %1972  ;;  %v2829_v12 = vld [vmem:[#allocation21_spill] sm:$0xff]  ;;  %v2830_v32 = vld [vmem:[#allocation19_spill] sm:$0xff] }
 0x343   :  { %v1975_v26 = vpop.eup %1974 }
 0x344   :  { %1978 = vrcp.f32 %v990_v13  ;;  %v997_v17 = vadd.f32 1.0, %v1975_v26 }
 0x346   :  { %1980 = vrcp.f32 %v997_v17 }
 0x34f   :  { %v1977_v30 = vpop.eup %1976 }
 0x350   :  { %v1001_v25 = vmul.f32 %v1977_v30, %v1973_v62 }
 0x351   :  { %v1979_v19 = vpop.eup %1978 }
 0x352   :  { %v1000_v23 = vmul.f32 %v1979_v19, %v2547_v29 }
 0x353   :  { %v1981_v8 = vpop.eup %1980 }
 0x354   :  { %v2589_v6 = vadd.f32 %v1001_v25, %v1000_v23 }
 0x356   :  { %1982 = vtanh.f32 %v2589_v6 }
 0x363   :  { %v1983_v53 = vpop.eup %1982 }
 0x364   :  { %v1004_v7 = vmul.f32 %v1983_v53, %v1981_v8 }
 0x366   :  { %v1005_v11 = vpack.c.bf16 %v1004_v7, %v1004_v7 }
 0x368   :  { %1039 = vmatmul.mubr.bf16.vlgmr.msra.gmra.mxu0 %v1005_v11  ;;  %1080 = vmatmul.mubr.bf16.vlgmr.msra.gmra.mxu1 %v1005_v11 }
 0x369   :  { %1118 = vmatpush1.bf16.msra.mxu0 %v2278_v36  ;;  %1159 = vmatpush1.bf16.msra.mxu1 %v2280_v37 }
 0x36a   :  { %1119 = vmatprep.subr.bf16.mxu0 %v2284_v38  ;;  %1160 = vmatprep.subr.bf16.mxu1 %v2286_v39 }
 0x36b   :  { %1149 = vmatprep.mubr.bf16.mxu0 %v2825_v10  ;;  %1190 = vmatprep.mubr.bf16.mxu1 %v2825_v10 }
 0x36d   :  { %1120 = vmatpush1.bf16.msra.mxu0 %v2288_v40  ;;  %1161 = vmatpush1.bf16.msra.mxu1 %v2292_v41 }
 0x36e   :  { %1121 = vmatprep.subr.bf16.mxu0 %v2296_v42  ;;  %1162 = vmatprep.subr.bf16.mxu1 %v2298_v43 }
 0x371   :  { %1122 = vmatpush1.bf16.msra.mxu0 %v2302_v45  ;;  %1163 = vmatpush1.bf16.msra.mxu1 %v2304_v46 }
 0x372   :  { %1123 = vmatprep.subr.bf16.mxu0 %v2308_v47  ;;  %1164 = vmatprep.subr.bf16.mxu1 %v2312_v48 }
 0x375   :  { %1124 = vmatpush1.bf16.msra.mxu0 %v2314_v49  ;;  %1165 = vmatpush1.bf16.msra.mxu1 %v2316_v50 }
 0x376   :  { %1125 = vmatprep.subr.bf16.mxu0 %v2320_v51  ;;  %1166 = vmatprep.subr.bf16.mxu1 %v2324_v52 }
 0x379   :  { %1126 = vmatpush1.bf16.msra.mxu0 %v2330_v54  ;;  %1167 = vmatpush1.bf16.msra.mxu1 %v2332_v55 }
 0x37a   :  { %1127 = vmatprep.subr.bf16.mxu0 %v2336_v56  ;;  %1168 = vmatprep.subr.bf16.mxu1 %v2338_v57 }
 0x37d   :  { %1128 = vmatpush1.bf16.msra.mxu0 %v2342_v58  ;;  %1169 = vmatpush1.bf16.msra.mxu1 %v2344_v59 }
 0x37e   :  { %1129 = vmatprep.subr.bf16.mxu0 %v2348_v60  ;;  %1170 = vmatprep.subr.bf16.mxu1 %v2350_v61 }
 0x381   :  { %1130 = vmatpush1.bf16.msra.mxu0 %v2356_v63  ;;  %1171 = vmatpush1.bf16.msra.mxu1 %v2358_v1 }
 0x382   :  { %1131 = vmatprep.subr.bf16.mxu0 %v2362_v2  ;;  %1172 = vmatprep.subr.bf16.mxu1 %v2364_v3 }
 0x385   :  { %1132 = vmatpush1.bf16.msra.mxu0 %v2368_v4  ;;  %1173 = vmatpush1.bf16.msra.mxu1 %v2370_v5 }
 0x386   :  { %1228 = vmatprep.subr.bf16.mxu0 %v2274_v33  ;;  %1269 = vmatprep.subr.bf16.mxu1 %v2276_v34 }
 0x428   :  { %v1040_v29 = vpop.f32.mrf.mxu0  ;;  %v1081_v21 = vpop.f32.mrf.mxu1 }
 0x429   :  { %v1088_v16 = vadd.f32 %v1040_v29, %v2827_v35  ;;  %v1090_v34 = vadd.f32 %v1081_v21, %v2830_v32 }
 0x42a   :  { %v1042_v9 = vpop.f32.mrf.mxu0  ;;  %v1083_v27 = vpop.f32.mrf.mxu1 }
 0x42b   :  { %v1753_v22 = vmul.f32 -1.442695, %v1088_v16  ;;  %v1089_v20 = vadd.f32 %v1042_v9, %v2828_v18  ;;  %v1091_v33 = vadd.f32 %v1083_v27, %v2829_v12 }
 0x42c   :  { %v1044_v24 = vpop.f32.mrf.mxu0  ;;  %v1085_v0 = vpop.f32.mrf.mxu1 }
 0x42d   :  { %1984 = vpow2.f32 %v1753_v22  ;;  %v1754_v28 = vmul.f32 -1.442695, %v1089_v20  ;;  %v1755_v13 = vmul.f32 -1.442695, %v1091_v33 }
 0x42e   :  { %v1045_v14 = vpop.f32.mrf.mxu0  ;;  %v1086_v15 = vpop.f32.mrf.mxu1 }
 0x42f   :  { %1986 = vpow2.f32 %v1754_v28 }
 0x430   :  { %1988 = vtanh.f32 %v1090_v34 }
 0x431   :  { %1990 = vpow2.f32 %v1755_v13 }
 0x43a   :  { %v1985_v62 = vpop.eup %1984 }
 0x43b   :  { %v1095_v26 = vadd.f32 1.0, %v1985_v62 }
 0x43c   :  { %v1987_v30 = vpop.eup %1986 }
 0x43d   :  { %1992 = vrcp.f32 %v1095_v26  ;;  %v1101_v25 = vadd.f32 1.0, %v1987_v30  ;;  %v1989_v19 = vpop.eup %1988 }
 0x43e   :  { %v1991_v17 = vpop.eup %1990 }
 0x43f   :  { %1994 = vrcp.f32 %v1101_v25  ;;  %v1108_v7 = vadd.f32 1.0, %v1991_v17  ;;  %v2683_v17 = vld [vmem:[#allocation9 + $0xe8] ss:$16 sps:$4 sm:$0xff]  }
 0x441   :  { %1996 = vrcp.f32 %v1108_v7  ;;  %v2697_v7 = vld [vmem:[#allocation9 + $0xc8] ss:$16 sps:$4 sm:$0xff]  }
 0x44a   :  { %v1993_v23 = vpop.eup %1992 }
 0x44b   :  { %v1112_v8 = vmul.f32 %v1993_v23, %v1989_v19  ;;  %v2680_v19 = vld [vmem:[#allocation9 + $0xe0] ss:$16 sps:$4 sm:$0xff]   ;;  %v2686_v23 = vld [vmem:[#allocation9 + $0xc4] ss:$16 sps:$4 sm:$0xff]  }
 0x44c   :  { %v1995_v53 = vpop.eup %1994 }
 0x44d   :  { %v1111_v11 = vmul.f32 %v1995_v53, %v2589_v6  ;;  %v2834_v6 = vld [vmem:[#allocation23_spill] sm:$0xff]  ;;  %v2694_v53 = vld [vmem:[#allocation9 + $0xc0] ss:$16 sps:$4 sm:$0xff]  }
 0x44e   :  { %v1997_v21 = vpop.eup %1996 }
 0x44f   :  { %v2631_v29 = vadd.f32 %v1112_v8, %v1111_v11  ;;  %v2689_v8 = vld [vmem:[#allocation9 + $0xcc] ss:$16 sps:$4 sm:$0xff]   ;;  %v2700_v11 = vld [vmem:[#allocation9 + $0xa4] ss:$16 sps:$4 sm:$0xff]  }
 0x451   :  { %1998 = vtanh.f32 %v2631_v29 }
 0x45e   :  { %v1999_v35 = vpop.eup %1998 }
 0x45f   :  { %v1115_v16 = vmul.f32 %v1999_v35, %v1997_v21  ;;  %v2706_v21 = vld [vmem:[#allocation9 + $0xa0] ss:$16 sps:$4 sm:$0xff]   ;;  %v2709_v35 = vld [vmem:[#allocation9 + $0xa8] ss:$16 sps:$4 sm:$0xff]  }
 0x461   :  { %v1116_v9 = vpack.c.bf16 %v1115_v16, %v1115_v16  ;;  %v2712_v16 = vld [vmem:[#allocation9 + $0x84] ss:$16 sps:$4 sm:$0xff]  }
 0x463   :  { %1150 = vmatmul.mubr.bf16.vlgmr.msra.gmra.mxu0 %v1116_v9  ;;  %1191 = vmatmul.mubr.bf16.vlgmr.msra.gmra.mxu1 %v1116_v9  ;;  %v2715_v9 = vld [vmem:[#allocation9 + $0x8c] ss:$16 sps:$4 sm:$0xff]  }
 0x464   :  { %1229 = vmatpush1.bf16.msra.mxu0 %v2278_v36  ;;  %1270 = vmatpush1.bf16.msra.mxu1 %v2280_v37  ;;  %v2666_v36 = vld [vmem:[#allocation9 + $0xe4] ss:$16 sps:$4 sm:$0xff]   ;;  %v2669_v37 = vld [vmem:[#allocation9 + $0xec] ss:$16 sps:$4 sm:$0xff]  }
 0x465   :  { %1230 = vmatprep.subr.bf16.mxu0 %v2284_v38  ;;  %1271 = vmatprep.subr.bf16.mxu1 %v2286_v39 }
 0x466   :  { %1260 = vmatprep.mubr.bf16.mxu0 %v2825_v10  ;;  %1301 = vmatprep.mubr.bf16.mxu1 %v2825_v10 }
 0x468   :  { %1231 = vmatpush1.bf16.msra.mxu0 %v2288_v40  ;;  %1272 = vmatpush1.bf16.msra.mxu1 %v2292_v41  ;;  %v2831_v40 = vld [vmem:[#allocation22_spill] sm:$0xff] }
 0x469   :  { %1232 = vmatprep.subr.bf16.mxu0 %v2296_v42  ;;  %1273 = vmatprep.subr.bf16.mxu1 %v2298_v43 }
 0x46c   :  { %1233 = vmatpush1.bf16.msra.mxu0 %v2302_v45  ;;  %1274 = vmatpush1.bf16.msra.mxu1 %v2304_v46  ;;  %v2832_v46 = vld [vmem:[#allocation24_spill] sm:$0xff] }
 0x46d   :  { %1234 = vmatprep.subr.bf16.mxu0 %v2308_v47  ;;  %1275 = vmatprep.subr.bf16.mxu1 %v2312_v48 }
 0x470   :  { %1235 = vmatpush1.bf16.msra.mxu0 %v2314_v49  ;;  %1276 = vmatpush1.bf16.msra.mxu1 %v2316_v50 }
 0x471   :  { %1236 = vmatprep.subr.bf16.mxu0 %v2320_v51  ;;  %1277 = vmatprep.subr.bf16.mxu1 %v2324_v52 }
 0x474   :  { %1237 = vmatpush1.bf16.msra.mxu0 %v2330_v54  ;;  %1278 = vmatpush1.bf16.msra.mxu1 %v2332_v55  ;;  %v2833_v54 = vld [vmem:[#allocation25_spill] sm:$0xff] }
 0x475   :  { %1238 = vmatprep.subr.bf16.mxu0 %v2336_v56  ;;  %1279 = vmatprep.subr.bf16.mxu1 %v2338_v57 }
 0x478   :  { %1239 = vmatpush1.bf16.msra.mxu0 %v2342_v58  ;;  %1280 = vmatpush1.bf16.msra.mxu1 %v2344_v59 }
 0x479   :  { %1240 = vmatprep.subr.bf16.mxu0 %v2348_v60  ;;  %1281 = vmatprep.subr.bf16.mxu1 %v2350_v61 }
 0x47c   :  { %1241 = vmatpush1.bf16.msra.mxu0 %v2356_v63  ;;  %1282 = vmatpush1.bf16.msra.mxu1 %v2358_v1 }
 0x47d   :  { %1242 = vmatprep.subr.bf16.mxu0 %v2362_v2  ;;  %1283 = vmatprep.subr.bf16.mxu1 %v2364_v3 }
 0x480   :  { %1243 = vmatpush1.bf16.msra.mxu0 %v2368_v4  ;;  %1284 = vmatpush1.bf16.msra.mxu1 %v2370_v5 }
 0x481   :  { %1339 = vmatprep.subr.bf16.mxu0 %v2666_v36  ;;  %1380 = vmatprep.subr.bf16.mxu1 %v2669_v37 }
 0x523   :  { %v1151_v38 = vpop.f32.mrf.mxu0  ;;  %v1192_v39 = vpop.f32.mrf.mxu1 }
 0x524   :  { %v1199_v41 = vadd.f32 %v1151_v38, %v2831_v40  ;;  %v1201_v27 = vadd.f32 %v1192_v39, %v2834_v6  ;;  %v2718_v38 = vld [vmem:[#allocation9 + $0x80] ss:$16 sps:$4 sm:$0xff]   ;;  %v2721_v39 = vld [vmem:[#allocation9 + $0x88] ss:$16 sps:$4 sm:$0xff]   ;;  %v2724_v40 = vld [vmem:[#allocation9 + $0x64] ss:$16 sps:$4 sm:$0xff]  }
 0x525   :  { %v1153_v42 = vpop.f32.mrf.mxu0  ;;  %v1194_v43 = vpop.f32.mrf.mxu1 }
 0x526   :  { %v1756_v45 = vmul.f32 -1.442695, %v1199_v41  ;;  %v1200_v47 = vadd.f32 %v1153_v42, %v2832_v46  ;;  %v1202_v55 = vadd.f32 %v1194_v43, %v2833_v54  ;;  %v2727_v41 = vld [vmem:[#allocation9 + $0x6c] ss:$16 sps:$4 sm:$0xff]   ;;  %v2730_v42 = vld [vmem:[#allocation9 + $0x60] ss:$16 sps:$4 sm:$0xff]  }
 0x527   :  { %v1155_v48 = vpop.f32.mrf.mxu0  ;;  %v1196_v49 = vpop.f32.mrf.mxu1  ;;  %v2733_v43 = vld [vmem:[#allocation9 + $0x68] ss:$16 sps:$4 sm:$0xff]  }
 0x528   :  { %2000 = vpow2.f32 %v1756_v45  ;;  %v1757_v50 = vmul.f32 -1.442695, %v1200_v47  ;;  %v1758_v22 = vmul.f32 -1.442695, %v1202_v55  ;;  %v2838_v48 = vld [vmem:[#allocation27_spill] sm:$0xff] }
 0x529   :  { %v1156_v51 = vpop.f32.mrf.mxu0  ;;  %v1197_v52 = vpop.f32.mrf.mxu1 }
 0x52a   :  { %2002 = vpow2.f32 %v1757_v50 }
 0x52b   :  { %2004 = vtanh.f32 %v1201_v27 }
 0x52c   :  { %2006 = vpow2.f32 %v1758_v22 }
 0x535   :  { %v2001_v18 = vpop.eup %2000 }
 0x536   :  { %v1206_v20 = vadd.f32 1.0, %v2001_v18 }
 0x537   :  { %v2003_v24 = vpop.eup %2002 }
 0x538   :  { %2008 = vrcp.f32 %v1206_v20  ;;  %v1212_v0 = vadd.f32 1.0, %v2003_v24  ;;  %v2005_v28 = vpop.eup %2004 }
 0x539   :  { %v2007_v14 = vpop.eup %2006 }
 0x53a   :  { %2010 = vrcp.f32 %v1212_v0  ;;  %v1219_v32 = vadd.f32 1.0, %v2007_v14 }
 0x53c   :  { %2012 = vrcp.f32 %v1219_v32  ;;  %v2086_v32 = vld [vmem:[#allocation9 + $0x40] ss:$16 sps:$4 sm:$0xff]  }
 0x545   :  { %v2009_v15 = vpop.eup %2008 }
 0x546   :  { %v1223_v12 = vmul.f32 %v2009_v15, %v2005_v28 }
 0x547   :  { %v2011_v33 = vpop.eup %2010 }
 0x548   :  { %v1222_v34 = vmul.f32 %v2011_v33, %v2631_v29  ;;  %v2703_v29 = vld [vmem:[#allocation9 + $0xac] ss:$16 sps:$4 sm:$0xff]  }
 0x549   :  { %v2013_v62 = vpop.eup %2012  ;;  %v2085_v33 = vld [vmem:[#allocation9 + $0x4c] ss:$16 sps:$4 sm:$0xff]  }
 0x54a   :  { %v2677_v13 = vadd.f32 %v1223_v12, %v1222_v34  ;;  %v2087_v34 = vld [vmem:[#allocation9 + $0x48] ss:$16 sps:$4 sm:$0xff]  }
 0x54c   :  { %2014 = vtanh.f32 %v2677_v13 }
 0x559   :  { %v2015_v26 = vpop.eup %2014 }
 0x55a   :  { %v1226_v30 = vmul.f32 %v2015_v26, %v2013_v62  ;;  %v2089_v62 = vld [vmem:[#allocation9 + $0x2c] ss:$16 sps:$4 sm:$0xff]   ;;  %v2090_v26 = vld [vmem:[#allocation9 + $0x20] ss:$16 sps:$4 sm:$0xff]  }
 0x55c   :  { %v1227_v25 = vpack.c.bf16 %v1226_v30, %v1226_v30  ;;  %v2091_v30 = vld [vmem:[#allocation9 + $0x28] ss:$16 sps:$4 sm:$0xff]  }
 0x55e   :  { %1261 = vmatmul.mubr.bf16.vlgmr.msra.gmra.mxu0 %v1227_v25  ;;  %1302 = vmatmul.mubr.bf16.vlgmr.msra.gmra.mxu1 %v1227_v25  ;;  %v2092_v25 = vld [vmem:[#allocation9 + $0x4] ss:$16 sps:$4 sm:$0xff]  }
 0x55f   :  { %1340 = vmatpush1.bf16.msra.mxu0 %v2680_v19  ;;  %1381 = vmatpush1.bf16.msra.mxu1 %v2683_v17 }
 0x560   :  { %1341 = vmatprep.subr.bf16.mxu0 %v2686_v23  ;;  %1382 = vmatprep.subr.bf16.mxu1 %v2689_v8 }
 0x561   :  { %1371 = vmatprep.mubr.bf16.mxu0 %v2825_v10  ;;  %1412 = vmatprep.mubr.bf16.mxu1 %v2825_v10 }
 0x563   :  { %1342 = vmatpush1.bf16.msra.mxu0 %v2694_v53  ;;  %1383 = vmatpush1.bf16.msra.mxu1 %v2697_v7 }
 0x564   :  { %1343 = vmatprep.subr.bf16.mxu0 %v2700_v11  ;;  %1384 = vmatprep.subr.bf16.mxu1 %v2703_v29 }
 0x567   :  { %1344 = vmatpush1.bf16.msra.mxu0 %v2706_v21  ;;  %1385 = vmatpush1.bf16.msra.mxu1 %v2709_v35 }
 0x568   :  { %1345 = vmatprep.subr.bf16.mxu0 %v2712_v16  ;;  %1386 = vmatprep.subr.bf16.mxu1 %v2715_v9 }
 0x56b   :  { %1346 = vmatpush1.bf16.msra.mxu0 %v2718_v38  ;;  %1387 = vmatpush1.bf16.msra.mxu1 %v2721_v39 }
 0x56c   :  { %1347 = vmatprep.subr.bf16.mxu0 %v2724_v40  ;;  %1388 = vmatprep.subr.bf16.mxu1 %v2727_v41 }
 0x56f   :  { %1348 = vmatpush1.bf16.msra.mxu0 %v2730_v42  ;;  %1389 = vmatpush1.bf16.msra.mxu1 %v2733_v43 }
 0x570   :  { %1349 = vmatprep.subr.bf16.mxu0 %v2336_v56  ;;  %1390 = vmatprep.subr.bf16.mxu1 %v2338_v57 }
 0x573   :  { %1350 = vmatpush1.bf16.msra.mxu0 %v2342_v58  ;;  %1391 = vmatpush1.bf16.msra.mxu1 %v2344_v59  ;;  %v2835_v58 = vld [vmem:[#allocation26_spill] sm:$0xff] }
 0x574   :  { %1351 = vmatprep.subr.bf16.mxu0 %v2348_v60  ;;  %1392 = vmatprep.subr.bf16.mxu1 %v2350_v61 }
 0x577   :  { %1352 = vmatpush1.bf16.msra.mxu0 %v2356_v63  ;;  %1393 = vmatpush1.bf16.msra.mxu1 %v2358_v1  ;;  %v2836_v1 = vld [vmem:[#allocation28_spill] sm:$0xff] }
 0x578   :  { %1353 = vmatprep.subr.bf16.mxu0 %v2362_v2  ;;  %1394 = vmatprep.subr.bf16.mxu1 %v2364_v3 }
 0x57b   :  { %1354 = vmatpush1.bf16.msra.mxu0 %v2368_v4  ;;  %1395 = vmatpush1.bf16.msra.mxu1 %v2370_v5  ;;  %v2837_v5 = vld [vmem:[#allocation29_spill] sm:$0xff] }
 0x57c   :  { %1450 = vmatprep.subr.bf16.mxu0 %v2666_v36  ;;  %1491 = vmatprep.subr.bf16.mxu1 %v2669_v37 }
 0x61e   :  { %v1262_v56 = vpop.f32.mrf.mxu0  ;;  %v1303_v57 = vpop.f32.mrf.mxu1 }
 0x61f   :  { %v1310_v59 = vadd.f32 %v1262_v56, %v2835_v58  ;;  %v1312_v37 = vadd.f32 %v1303_v57, %v2838_v48  ;;  %v2842_v57 = vld [vmem:[#allocation31_spill] sm:$0xff] }
 0x620   :  { %v1264_v60 = vpop.f32.mrf.mxu0  ;;  %v1305_v61 = vpop.f32.mrf.mxu1 }
 0x621   :  { %v1759_v63 = vmul.f32 -1.442695, %v1310_v59  ;;  %v1311_v45 = vadd.f32 %v1264_v60, %v2836_v1  ;;  %v1313_v36 = vadd.f32 %v1305_v61, %v2837_v5 }
 0x622   :  { %v1266_v2 = vpop.f32.mrf.mxu0  ;;  %v1307_v46 = vpop.f32.mrf.mxu1 }
 0x623   :  { %2016 = vpow2.f32 %v1759_v63  ;;  %v1760_v3 = vmul.f32 -1.442695, %v1311_v45  ;;  %v1761_v49 = vmul.f32 -1.442695, %v1313_v36 }
 0x624   :  { %v1267_v4 = vpop.f32.mrf.mxu0  ;;  %v1308_v47 = vpop.f32.mrf.mxu1 }
 0x625   :  { %2018 = vpow2.f32 %v1760_v3 }
 0x626   :  { %2020 = vtanh.f32 %v1312_v37 }
 0x627   :  { %2022 = vpow2.f32 %v1761_v49 }
 0x630   :  { %v2017_v50 = vpop.eup %2016 }
 0x631   :  { %v1317_v51 = vadd.f32 1.0, %v2017_v50 }
 0x632   :  { %v2019_v52 = vpop.eup %2018 }
 0x633   :  { %2024 = vrcp.f32 %v1317_v51  ;;  %v1323_v54 = vadd.f32 1.0, %v2019_v52  ;;  %v2021_v55 = vpop.eup %2020  ;;  %v2216_v51 = vmov 0.0   ;;  %v1580_v52 = vld [vmem:[#allocation10 + $0x78] sm:$0xff] }
 0x634   :  { %v2023_v6 = vpop.eup %2022 }
 0x635   :  { %2026 = vrcp.f32 %v1323_v54  ;;  %v1330_v20 = vadd.f32 1.0, %v2023_v6  ;;  %v1579_v54 = vld [vmem:[#allocation10 + $0x70] sm:$0xff]  ;;  %v1577_v6 = vld [vmem:[#allocation10 + $0x60] sm:$0xff] }
 0x637   :  { %2028 = vrcp.f32 %v1330_v20  ;;  %v1573_v20 = vld [vmem:[#allocation10 + $0x40] sm:$0xff] }
 0x640   :  { %v2025_v27 = vpop.eup %2024 }
 0x641   :  { %v1334_v22 = vmul.f32 %v2025_v27, %v2021_v55  ;;  %v1578_v55 = vld [vmem:[#allocation10 + $0x68] sm:$0xff]  ;;  %v1576_v27 = vld [vmem:[#allocation10 + $0x58] sm:$0xff] }
 0x642   :  { %v2027_v18 = vpop.eup %2026 }
 0x643   :  { %v1333_v24 = vmul.f32 %v2027_v18, %v2677_v13  ;;  %v2088_v13 = vld [vmem:[#allocation9 + $0x24] ss:$16 sps:$4 sm:$0xff]   ;;  %v1574_v18 = vld [vmem:[#allocation10 + $0x48] sm:$0xff] }
 0x644   :  { %v2029_v28 = vpop.eup %2028 }
 0x645   :  { %v2755_v0 = vadd.f32 %v1334_v22, %v1333_v24  ;;  %v1575_v22 = vld [vmem:[#allocation10 + $0x50] sm:$0xff]  ;;  %v1572_v24 = vld [vmem:[#allocation10 + $0x38] sm:$0xff] }
 0x647   :  { %2030 = vtanh.f32 %v2755_v0 }
 0x654   :  { %v2031_v14 = vpop.eup %2030 }
 0x655   :  { %v1337_v15 = vmul.f32 %v2031_v14, %v2029_v28  ;;  %v1570_v28 = vld [vmem:[#allocation10 + $0x28] sm:$0xff]  ;;  %v1569_v14 = vld [vmem:[#allocation10 + $0x20] sm:$0xff] }
 0x657   :  { %v1338_v12 = vpack.c.bf16 %v1337_v15, %v1337_v15  ;;  %v1568_v15 = vld [vmem:[#allocation10 + $0x18] sm:$0xff] }
 0x659   :  { %1372 = vmatmul.mubr.bf16.vlgmr.msra.gmra.mxu0 %v1338_v12  ;;  %1413 = vmatmul.mubr.bf16.vlgmr.msra.gmra.mxu1 %v1338_v12  ;;  %v1567_v12 = vld [vmem:[#allocation10 + $0x10] sm:$0xff] }
 0x65a   :  { %1451 = vmatpush1.bf16.msra.mxu0 %v2680_v19  ;;  %1492 = vmatpush1.bf16.msra.mxu1 %v2683_v17  ;;  %v2093_v19 = vld [vmem:[#allocation9 + $0xc] ss:$16 sps:$4 sm:$0xff]   ;;  %v2094_v17 = vld [vmem:[#allocation9] ss:$16 sps:$4 sm:$0xff]  }
 0x65b   :  { %1452 = vmatprep.subr.bf16.mxu0 %v2686_v23  ;;  %1493 = vmatprep.subr.bf16.mxu1 %v2689_v8  ;;  %v2095_v23 = vld [vmem:[#allocation9 + $0x8] ss:$16 sps:$4 sm:$0xff]  }
 0x65c   :  { %1482 = vmatprep.mubr.bf16.mxu0 %v2825_v10  ;;  %1523 = vmatprep.mubr.bf16.mxu1 %v2825_v10  ;;  %v2084_v10 = vld [vmem:[#allocation9 + $0x44] ss:$16 sps:$4 sm:$0xff]  }
 0x65e   :  { %1453 = vmatpush1.bf16.msra.mxu0 %v2694_v53  ;;  %1494 = vmatpush1.bf16.msra.mxu1 %v2697_v7  ;;  %v2839_v7 = vld [vmem:[#allocation30_spill] sm:$0xff] }
 0x65f   :  { %1454 = vmatprep.subr.bf16.mxu0 %v2700_v11  ;;  %1495 = vmatprep.subr.bf16.mxu1 %v2703_v29 }
 0x662   :  { %1455 = vmatpush1.bf16.msra.mxu0 %v2706_v21  ;;  %1496 = vmatpush1.bf16.msra.mxu1 %v2709_v35 }
 0x663   :  { %1456 = vmatprep.subr.bf16.mxu0 %v2712_v16  ;;  %1497 = vmatprep.subr.bf16.mxu1 %v2715_v9  ;;  %v2840_v16 = vld [vmem:[#allocation32_spill] sm:$0xff] }
 0x666   :  { %1457 = vmatpush1.bf16.msra.mxu0 %v2718_v38  ;;  %1498 = vmatpush1.bf16.msra.mxu1 %v2721_v39 }
 0x667   :  { %1458 = vmatprep.subr.bf16.mxu0 %v2724_v40  ;;  %1499 = vmatprep.subr.bf16.mxu1 %v2727_v41 }
 0x66a   :  { %1459 = vmatpush1.bf16.msra.mxu0 %v2730_v42  ;;  %1500 = vmatpush1.bf16.msra.mxu1 %v2733_v43  ;;  %v2841_v43 = vld [vmem:[#allocation33_spill] sm:$0xff] }
 0x66b   :  { %1460 = vmatprep.subr.bf16.mxu0 %v2084_v10  ;;  %1501 = vmatprep.subr.bf16.mxu1 %v2085_v33  ;;  %v1566_v10 = vld [vmem:[#allocation10 + $0x8] sm:$0xff]  ;;  %v1565_v33 = vld [vmem:[#allocation10] sm:$0xff] }
 0x66e   :  { %1461 = vmatpush1.bf16.msra.mxu0 %v2086_v32  ;;  %1502 = vmatpush1.bf16.msra.mxu1 %v2087_v34 }
 0x66f   :  { %1462 = vmatprep.subr.bf16.mxu0 %v2088_v13  ;;  %1503 = vmatprep.subr.bf16.mxu1 %v2089_v62  ;;  %v2843_v13 = vld [vmem:[#allocation34_spill] sm:$0xff] }
 0x672   :  { %1463 = vmatpush1.bf16.msra.mxu0 %v2090_v26  ;;  %1504 = vmatpush1.bf16.msra.mxu1 %v2091_v30 }
 0x673   :  { %1464 = vmatprep.subr.bf16.mxu0 %v2092_v25  ;;  %1505 = vmatprep.subr.bf16.mxu1 %v2093_v19 }
 0x676   :  { %1465 = vmatpush1.bf16.msra.mxu0 %v2094_v17  ;;  %1506 = vmatpush1.bf16.msra.mxu1 %v2095_v23 }
 0x677   :  { %1786 = vmatprep.subr.mxu0 %v2216_v51 }
 0x719   :  { %v1373_v8 = vpop.f32.mrf.mxu0  ;;  %v1414_v53 = vpop.f32.mrf.mxu1 }
 0x71a   :  { %v1421_v11 = vadd.f32 %v1373_v8, %v2839_v7  ;;  %v1423_v58 = vadd.f32 %v1414_v53, %v2842_v57 }
 0x71b   :  { %v1375_v29 = vpop.f32.mrf.mxu0  ;;  %v1416_v21 = vpop.f32.mrf.mxu1 }
 0x71c   :  { %v1762_v35 = vmul.f32 -1.442695, %v1421_v11  ;;  %v1422_v9 = vadd.f32 %v1375_v29, %v2840_v16  ;;  %v1424_v56 = vadd.f32 %v1416_v21, %v2841_v43  ;;  %v2844_v29 = vld [vmem:[#allocation35_spill] sm:$0xff] }
 0x71d   :  { %v1377_v38 = vpop.f32.mrf.mxu0  ;;  %v1418_v39 = vpop.f32.mrf.mxu1 }
 0x71e   :  { %2032 = vpow2.f32 %v1762_v35  ;;  %v1763_v40 = vmul.f32 -1.442695, %v1422_v9  ;;  %v1764_v59 = vmul.f32 -1.442695, %v1424_v56 }
 0x71f   :  { %v1378_v41 = vpop.f32.mrf.mxu0  ;;  %v1419_v42 = vpop.f32.mrf.mxu1 }
 0x720   :  { %2034 = vpow2.f32 %v1763_v40 }
 0x721   :  { %2036 = vtanh.f32 %v1423_v58 }
 0x722   :  { %2038 = vpow2.f32 %v1764_v59 }
 0x72b   :  { %v2033_v60 = vpop.eup %2032 }
 0x72c   :  { %v1428_v61 = vadd.f32 1.0, %v2033_v60 }
 0x72d   :  { %v2035_v63 = vpop.eup %2034 }
 0x72e   :  { %2040 = vrcp.f32 %v1428_v61  ;;  %v1434_v1 = vadd.f32 1.0, %v2035_v63  ;;  %v2037_v45 = vpop.eup %2036  ;;  %v1768_v61 = vld [vmem:[%s2802_s5] ss:$0 sm:$0xff] }
 0x72f   :  { %v2039_v2 = vpop.eup %2038 }
 0x730   :  { %2042 = vrcp.f32 %v1434_v1  ;;  %v1441_v47 = vadd.f32 1.0, %v2039_v2 }
 0x732   :  { %2044 = vrcp.f32 %v1441_v47 }
 0x73b   :  { %v2041_v46 = vpop.eup %2040 }
 0x73c   :  { %v1445_v3 = vmul.f32 %v2041_v46, %v2037_v45 }
 0x73d   :  { %v2043_v4 = vpop.eup %2042 }
 0x73e   :  { %v1444_v5 = vmul.f32 %v2043_v4, %v2755_v0  ;;  %v1571_v0 = vld [vmem:[#allocation10 + $0x30] sm:$0xff] }
 0x73f   :  { %v2045_v48 = vpop.eup %2044 }
 0x740   :  { %v2783_v36 = vadd.f32 %v1445_v3, %v1444_v5 }
 0x742   :  { %2046 = vtanh.f32 %v2783_v36 }
 0x74f   :  { %v2047_v37 = vpop.eup %2046 }
 0x750   :  { %v1448_v49 = vmul.f32 %v2047_v37, %v2045_v48 }
 0x752   :  { %v1449_v50 = vpack.c.bf16 %v1448_v49, %v1448_v49 }
 0x754   :  { %1483 = vmatmul.mubr.bf16.vlgmr.msra.gmra.mxu0 %v1449_v50  ;;  %1524 = vmatmul.mubr.bf16.vlgmr.msra.gmra.mxu1 %v1449_v50 }
 0x755   :  { %1787 = vmatpush3.msra.mxu0 %v1580_v52  ;;  %1818 = vmatprep.mubr.msk.f32.mxu0 %vm2217_vm0, %v2216_v51 }
 0x756   :  { %1788 = vmatprep.subr.mxu0 %v2216_v51 }
 0x757   :  { %1789 = vmatpush3.msra.mxu0 %v1579_v54 }
 0x758   :  { %1790 = vmatprep.subr.mxu0 %v2216_v51 }
 0x759   :  { %1791 = vmatpush3.msra.mxu0 %v1578_v55 }
 0x75a   :  { %1792 = vmatprep.subr.mxu0 %v2216_v51 }
 0x75b   :  { %1793 = vmatpush3.msra.mxu0 %v1577_v6 }
 0x75c   :  { %1794 = vmatprep.subr.mxu0 %v2216_v51 }
 0x75d   :  { %1795 = vmatpush3.msra.mxu0 %v1576_v27 }
 0x75e   :  { %1796 = vmatprep.subr.mxu0 %v2216_v51 }
 0x75f   :  { %1797 = vmatpush3.msra.mxu0 %v1575_v22 }
 0x760   :  { %1798 = vmatprep.subr.mxu0 %v2216_v51 }
 0x761   :  { %1799 = vmatpush3.msra.mxu0 %v1574_v18 }
 0x762   :  { %1800 = vmatprep.subr.mxu0 %v2216_v51 }
 0x763   :  { %1801 = vmatpush3.msra.mxu0 %v1573_v20 }
 0x764   :  { %1802 = vmatprep.subr.mxu0 %v2216_v51 }
 0x765   :  { %1803 = vmatpush3.msra.mxu0 %v1572_v24 }
 0x766   :  { %1804 = vmatprep.subr.mxu0 %v2216_v51 }
 0x767   :  { %1805 = vmatpush3.msra.mxu0 %v1571_v0 }
 0x768   :  { %1806 = vmatprep.subr.mxu0 %v2216_v51 }
 0x769   :  { %1807 = vmatpush3.msra.mxu0 %v1570_v28 }
 0x76a   :  { %1808 = vmatprep.subr.mxu0 %v2216_v51 }
 0x76b   :  { %1809 = vmatpush3.msra.mxu0 %v1569_v14 }
 0x76c   :  { %1810 = vmatprep.subr.mxu0 %v2216_v51 }
 0x76d   :  { %1811 = vmatpush3.msra.mxu0 %v1568_v15 }
 0x76e   :  { %1812 = vmatprep.subr.mxu0 %v2216_v51 }
 0x76f   :  { %1813 = vmatpush3.msra.mxu0 %v1567_v12 }
 0x770   :  { %1814 = vmatprep.subr.mxu0 %v2216_v51 }
 0x771   :  { %1815 = vmatpush3.msra.mxu0 %v1566_v10 }
 0x772   :  { %1816 = vmatprep.subr.mxu0 %v2216_v51 }
 0x773   :  { %1817 = vmatpush3.msra.mxu0 %v1565_v33 }
 0x814   :  { %v1484_v32 = vpop.f32.mrf.mxu0  ;;  %v1525_v34 = vpop.f32.mrf.mxu1 }
 0x815   :  { %v1532_v62 = vadd.f32 %v1484_v32, %v2843_v13  ;;  %v1534_v21 = vadd.f32 %v1525_v34, %v2844_v29 }
 0x816   :  { %v1486_v26 = vpop.f32.mrf.mxu0  ;;  %v1527_v30 = vpop.f32.mrf.mxu1 }
 0x817   :  { %v1765_v25 = vmul.f32 -1.442695, %v1532_v62  ;;  %v1533_v19 = vadd.f32 %v1486_v26, %v2495_v31  ;;  %v1535_v11 = vadd.f32 %v1527_v30, %v2498_v44 }
 0x818   :  { %v1488_v17 = vpop.f32.mrf.mxu0  ;;  %v1529_v23 = vpop.f32.mrf.mxu1 }
 0x819   :  { %2048 = vpow2.f32 %v1765_v25  ;;  %v1766_v8 = vmul.f32 -1.442695, %v1533_v19  ;;  %v1767_v35 = vmul.f32 -1.442695, %v1535_v11 }
 0x81a   :  { %v1489_v53 = vpop.f32.mrf.mxu0  ;;  %v1530_v7 = vpop.f32.mrf.mxu1 }
 0x81b   :  { %2050 = vpow2.f32 %v1766_v8 }
 0x81c   :  { %2052 = vtanh.f32 %v1534_v21 }
 0x81d   :  { %2054 = vpow2.f32 %v1767_v35 }
 0x826   :  { %v2049_v16 = vpop.eup %2048 }
 0x827   :  { %v1539_v9 = vadd.f32 1.0, %v2049_v16 }
 0x828   :  { %v2051_v38 = vpop.eup %2050 }
 0x829   :  { %2056 = vrcp.f32 %v1539_v9  ;;  %v1545_v39 = vadd.f32 1.0, %v2051_v38  ;;  %v2053_v31 = vpop.eup %2052 }
 0x82a   :  { %v2055_v40 = vpop.eup %2054 }
 0x82b   :  { %2058 = vrcp.f32 %v1545_v39  ;;  %v1552_v56 = vadd.f32 1.0, %v2055_v40 }
 0x82d   :  { %2060 = vrcp.f32 %v1552_v56 }
 0x836   :  { %v2057_v41 = vpop.eup %2056 }
 0x837   :  { %v1556_v42 = vmul.f32 %v2057_v41, %v2053_v31 }
 0x838   :  { %v2059_v43 = vpop.eup %2058 }
 0x839   :  { %v1555_v57 = vmul.f32 %v2059_v43, %v2783_v36 }
 0x83a   :  { %v2061_v58 = vpop.eup %2060 }
 0x83b   :  { %v1557_v44 = vadd.f32 %v1556_v42, %v1555_v57 }
 0x83d   :  { %2062 = vtanh.f32 %v1557_v44 }
 0x84a   :  { %v2063_v59 = vpop.eup %2062 }
 0x84b   :  { %v1559_v60 = vmul.f32 %v2063_v59, %v2061_v58 }
 0x84d   :  { %1819 = vmatmul.mubr.f32.vlgmr.msra.gmra.mxu0 %v1559_v60 }
 0x90d   :  { %v1654_v63 = vpop.f32.mrf.mxu0 }
 0x90e   :  { %v1655_v1 = vadd.f32 %v1768_v61, %v1654_v63 }
 0x90f   :  { %v1820_v45 = vpop.f32.mrf.mxu0 }
 0x910   :  { %1658 = vst [vmem:[#allocation12] sm:$0xff] %v1655_v1 }
 0x911   :  { %2187 = shalt.err (!%p2184_p10)
}
 0x912   :  { %1668 = dma.vmem_to_hbm [thread:$0]  %s1666_s23, 128, %s2803_s6, [#allocation6]  }
 0x913   :  { %2202 = dma.done.wait [#allocation6], 128  }
 0x914   :  { %2203 = vsyncadd [#allocation6], 4294967168 }
 0x915   :  { %1672 = vsyncpa [#allocation5], 1 }
 0x916   :  { %1673 = vsyncpa [#allocation8], 1 }
 0x917   :  { %1674 = vsyncpa [#allocation11], 1 }
 0x918   :  { %1675 = vsyncpa [#allocation6], 1 }

</bundles_post_ra>
